<compile_context>
chip_gen: v7x
topology: tpu7x:2x2x1
jax: 0.10.0
libtpu: 0.0.40
codegen_flags: <defaults>
</compile_context>

<pallas_src>
import functools
import math

import jax
import jax.numpy as jnp
from jax import lax
from jax.experimental import pallas as pl
from jax.experimental.pallas import tpu as pltpu


def _transformer_block_kernel(
    x_ref, cos_ref, sin_ref,
    wq_ref, wk_ref, wv_ref, wo_ref, w1_ref, w2_ref, w3_ref,
    anw_ref, fnw_ref,
    o_ref,
    hn_scratch,
    *, n_heads, n_kv_heads, head_dim, eps):
  n_rep = n_heads // n_kv_heads
  hd = head_dim
  hd2 = head_dim // 2
  j = pl.program_id(1)

  # ---- attention + norms: only on the first FFN-chunk step -----------------
  @pl.when(j == 0)
  def _attention_and_norms():
    x = x_ref[0]                                          # (seq, dim) f32

    # attention RMSNorm (f32 VPU math; bf16 operand for the MXU)
    ms = jnp.mean(x * x, axis=-1, keepdims=True)
    xn = (x * lax.rsqrt(ms + eps) * anw_ref[0]).astype(jnp.bfloat16)

    # q/k/v projections (bf16 MXU, f32 accumulation).  wq/wk columns are in
    # per-head rotate-half order: [r0..r_{hd/2-1}, i0..i_{hd/2-1}].
    xq = jnp.dot(xn, wq_ref[...], preferred_element_type=jnp.float32)
    xk = jnp.dot(xn, wk_ref[...], preferred_element_type=jnp.float32)
    xv = jnp.dot(xn, wv_ref[...], preferred_element_type=jnp.float32)

    cos = cos_ref[...]                                    # (seq, hd2) f32
    sin = sin_ref[...]
    scale = 1.0 / math.sqrt(hd)

    acc = jnp.zeros_like(x)                               # (seq, dim) f32
    for kvh in range(n_kv_heads):
      # hoist per-kv-head work out of the q-head loop (done once per kv head)
      kh = xk[:, kvh * hd:(kvh + 1) * hd]
      kr, ki = kh[:, :hd2], kh[:, hd2:]
      k_rot = jnp.concatenate(
          [kr * cos - ki * sin, kr * sin + ki * cos], axis=-1
      ).astype(jnp.bfloat16)
      vh = xv[:, kvh * hd:(kvh + 1) * hd].astype(jnp.bfloat16)

      for r in range(n_rep):
        h = kvh * n_rep + r
        qh = xq[:, h * hd:(h + 1) * hd]
        qr, qi = qh[:, :hd2], qh[:, hd2:]
        q_rot = (jnp.concatenate(
            [qr * cos - qi * sin, qr * sin + qi * cos], axis=-1) * scale
        ).astype(jnp.bfloat16)

        # scores = q_rot @ k_rot^T without an explicit transpose
        s = lax.dot_general(q_rot, k_rot, (((1,), (1,)), ((), ())),
                            preferred_element_type=jnp.float32)
        m = jnp.max(s, axis=-1, keepdims=True)
        p = jnp.exp(s - m)
        l = jnp.sum(p, axis=-1, keepdims=True)
        p = (p * pl.reciprocal(l, approx=True)).astype(jnp.bfloat16)

        head_out = jnp.dot(p, vh, preferred_element_type=jnp.float32)
        # fold wo into the loop: accumulate head_out @ wo[h*hd:(h+1)*hd, :]
        acc = acc + jnp.dot(head_out.astype(jnp.bfloat16),
                            wo_ref[pl.ds(h * hd, hd), :],
                            preferred_element_type=jnp.float32)

    h_res = x + acc
    o_ref[0] = h_res                                      # residual; FFN adds below

    # ffn RMSNorm, stored bf16 for the streamed FFN matmuls
    ms2 = jnp.mean(h_res * h_res, axis=-1, keepdims=True)
    hn = h_res * lax.rsqrt(ms2 + eps) * fnw_ref[0]
    hn_scratch[...] = hn.astype(jnp.bfloat16)

  # ---- SwiGLU FFN chunk over the hidden dimension (every j) ----------------
  hn = hn_scratch[...]                                    # (seq, dim) bf16
  g = jnp.dot(hn, w1_ref[...], preferred_element_type=jnp.float32)
  u = jnp.dot(hn, w3_ref[...], preferred_element_type=jnp.float32)
  silu = g * (1.0 / (1.0 + jnp.exp(-g)))
  act = (silu * u).astype(jnp.bfloat16)
  o_ref[0] += jnp.dot(act, w2_ref[...], preferred_element_type=jnp.float32)


def _rotate_half_perm(n_heads, head_dim):
  """Column permutation: per-head interleaved [r0,i0,r1,i1,..] -> [r.. | i..]."""
  hd2 = head_dim // 2
  idx = []
  for h in range(n_heads):
    base = h * head_dim
    idx += [base + 2 * t for t in range(hd2)]        # reals
    idx += [base + 2 * t + 1 for t in range(hd2)]    # imags
  return jnp.asarray(idx, dtype=jnp.int32)


def transformer_block_pallas(x, cos, sin, params, *, n_heads, n_kv_heads,
                             eps=1e-5, ffn_block=512):
  """x: (bs, seq, dim) f32; cos/sin: (seq, head_dim//2) f32; params: weights."""
  wq, wk, wv, wo, w1, w2, w3, anw, fnw = params
  bs, seq, dim = x.shape
  head_dim = dim // n_heads
  Dq = n_heads * head_dim
  Dk = n_kv_heads * head_dim
  hidden = w1.shape[1]

  # host glue: rotate-half column layout for q/k so the kernel swap is free
  wq_rh = wq[:, _rotate_half_perm(n_heads, head_dim)]
  wk_rh = wk[:, _rotate_half_perm(n_kv_heads, head_dim)]

  # bf16 weight storage (halves HBM/VMEM bytes; MXU-friendly)
  bf = jnp.bfloat16
  wq_b, wk_b, wv_b, wo_b = (w.astype(bf) for w in (wq_rh, wk_rh, wv, wo))
  w1_b, w2_b, w3_b = (w.astype(bf) for w in (w1, w2, w3))

  # FFN hidden tiling: stream w1/w3 column blocks and w2 row blocks.
  if hidden > ffn_block and hidden % ffn_block == 0 and ffn_block % 128 == 0:
    h_tile = ffn_block
  else:
    h_tile = hidden
  n_h = hidden // h_tile

  kernel = functools.partial(
      _transformer_block_kernel,
      n_heads=n_heads, n_kv_heads=n_kv_heads, head_dim=head_dim, eps=eps)

  in_specs = [
      pl.BlockSpec((1, seq, dim), lambda b, j: (b, 0, 0)),      # x
      pl.BlockSpec((seq, head_dim // 2), lambda b, j: (0, 0)),  # cos (resident)
      pl.BlockSpec((seq, head_dim // 2), lambda b, j: (0, 0)),  # sin (resident)
      pl.BlockSpec((dim, Dq), lambda b, j: (0, 0)),             # wq (rotate-half cols)
      pl.BlockSpec((dim, Dk), lambda b, j: (0, 0)),             # wk (rotate-half cols)
      pl.BlockSpec((dim, Dk), lambda b, j: (0, 0)),             # wv
      pl.BlockSpec((Dq, dim), lambda b, j: (0, 0)),             # wo
      pl.BlockSpec((dim, h_tile), lambda b, j: (0, j)),         # w1 column block
      pl.BlockSpec((h_tile, dim), lambda b, j: (j, 0)),         # w2 row block
      pl.BlockSpec((dim, h_tile), lambda b, j: (0, j)),         # w3 column block
      pl.BlockSpec((1, dim), lambda b, j: (0, 0)),              # attention_norm w
      pl.BlockSpec((1, dim), lambda b, j: (0, 0)),              # ffn_norm w
  ]

  return pl.pallas_call(
      kernel,
      out_shape=jax.ShapeDtypeStruct((bs, seq, dim), jnp.float32),
      grid_spec=pltpu.PrefetchScalarGridSpec(
          num_scalar_prefetch=0,
          grid=(bs, n_h),
          in_specs=in_specs,
          out_specs=pl.BlockSpec((1, seq, dim), lambda b, j: (b, 0, 0)),
          scratch_shapes=[pltpu.VMEM((seq, dim), jnp.bfloat16)],  # hn
      ),
      compiler_params=pltpu.CompilerParams(
          dimension_semantics=("parallel", "arbitrary")),
  )(x, cos, sin, wq_b, wk_b, wv_b, wo_b, w1_b, w2_b, w3_b, anw, fnw)


# ---------------- pure-JAX reference (mirrors the PyTorch module) ----------------
def transformer_block_ref(x, cos, sin, params, *, n_heads, n_kv_heads, eps=1e-5):
  wq, wk, wv, wo, w1, w2, w3, anw, fnw = params
  bs, seq, dim = x.shape
  hd = dim // n_heads
  n_rep = n_heads // n_kv_heads

  def rms(v, w):
    return v * lax.rsqrt(jnp.mean(v * v, -1, keepdims=True) + eps) * w.reshape(-1)

  xn = rms(x, anw)
  xq = (xn @ wq).reshape(bs, seq, n_heads, hd)
  xk = (xn @ wk).reshape(bs, seq, n_kv_heads, hd)
  xv = (xn @ wv).reshape(bs, seq, n_kv_heads, hd)

  c = cos[:, :, None, :]
  s = sin[:, :, None, :]

  def rot(t):
    tr = t[..., 0::2]
    ti = t[..., 1::2]
    orr = tr * c - ti * s
    oii = tr * s + ti * c
    return jnp.stack([orr, oii], axis=-1).reshape(t.shape)

  xq = rot(xq)
  xk = rot(xk)
  xk = jnp.repeat(xk, n_rep, axis=2)      # repeat_kv (repeat_interleave)
  xv = jnp.repeat(xv, n_rep, axis=2)

  scale = 1.0 / math.sqrt(hd)
  scores = jnp.einsum('bqhd,bkhd->bhqk', xq, xk) * scale
  p = jax.nn.softmax(scores, axis=-1)     # non-causal (flash_attn_func causal=False)
  out = jnp.einsum('bhqk,bkhd->bqhd', p, xv).reshape(bs, seq, dim)

  h = x + out @ wo
  hn = rms(h, fnw)
  ff = (jax.nn.silu(hn @ w1) * (hn @ w3)) @ w2
  return h + ff


if __name__ == "__main__":
  # small shapes consistent with the module
  bs, seq, dim = 2, 8, 32
  n_heads, n_kv_heads = 4, 2
  head_dim = dim // n_heads
  multiple_of = 32
  layer_id, n_layers = 0, 2
  norm_eps = 1e-5

  # FeedForward hidden dim (matches the PyTorch construction, ffn_dim_multiplier=None)
  hidden_dim = 4 * dim
  hidden_dim = int(2 * hidden_dim / 3)
  hidden_dim = multiple_of * ((hidden_dim + multiple_of - 1) // multiple_of)  # 96

  init_std = 0.02 / (2 * (layer_id + 1)) ** 0.5   # depth_init=True

  key = jax.random.PRNGKey(0)
  ks = jax.random.split(key, 9)
  Dq = n_heads * head_dim
  Dk = n_kv_heads * head_dim
  # weights stored as (in, out) = transpose of nn.Linear.weight
  # TODO(synk): plain normal init instead of trunc_normal_ (values are synthetic anyway)
  wq = 0.02 * jax.random.normal(ks[0], (dim, Dq), jnp.float32)
  wk = 0.02 * jax.random.normal(ks[1], (dim, Dk), jnp.float32)
  wv = 0.02 * jax.random.normal(ks[2], (dim, Dk), jnp.float32)
  wo = init_std * jax.random.normal(ks[3], (Dq, dim), jnp.float32)
  w1 = 0.02 * jax.random.normal(ks[4], (dim, hidden_dim), jnp.float32)
  w2 = init_std * jax.random.normal(ks[5], (hidden_dim, dim), jnp.float32)
  w3 = init_std * jax.random.normal(ks[6], (dim, hidden_dim), jnp.float32)
  anw = jnp.ones((1, dim), jnp.float32)   # attention_norm weight
  fnw = jnp.ones((1, dim), jnp.float32)   # ffn_norm weight
  params = (wq, wk, wv, wo, w1, w2, w3, anw, fnw)

  x = jax.random.normal(ks[7], (bs, seq, dim), jnp.float32)

  # precomputed rotary frequencies (cos/sin of freqs_cis): position-only (seq, hd//2)
  inv_freq = 1.0 / (10000.0 ** (jnp.arange(0, head_dim, 2, dtype=jnp.float32) / head_dim))
  angles = jnp.arange(seq, dtype=jnp.float32)[:, None] * inv_freq[None, :]   # (seq, hd//2)
  cos = jnp.cos(angles)
  sin = jnp.sin(angles)

  out = transformer_block_pallas(x, cos, sin, params,
                                 n_heads=n_heads, n_kv_heads=n_kv_heads, eps=norm_eps)
  out = jax.block_until_ready(out)

  cos_b = jnp.broadcast_to(cos[None], (bs, seq, head_dim // 2))
  sin_b = jnp.broadcast_to(sin[None], (bs, seq, head_dim // 2))
  ref = transformer_block_ref(x, cos_b, sin_b, params,
                              n_heads=n_heads, n_kv_heads=n_kv_heads, eps=norm_eps)
  assert out.shape == (bs, seq, dim)
  # bf16 MXU operands + approx reciprocal -> compare against f32 ref with a
  # correspondingly looser tolerance.
  err = float(jnp.max(jnp.abs(out - ref)))
  assert jnp.allclose(out, ref, atol=2e-2, rtol=2e-2), err
  print("KERNEL_OK")
</pallas_src>

<mosaic_0001>
module attributes {stable_mosaic.version = 11 : i64} {
  func.func @_transformer_block_kernel(%arg0: i32, %arg1: i32, %arg2: memref<1x8x32xf32, #tpu.memory_space<vmem>>, %arg3: memref<8x4xf32, #tpu.memory_space<vmem>>, %arg4: memref<8x4xf32, #tpu.memory_space<vmem>>, %arg5: memref<32x32xbf16, #tpu.memory_space<vmem>>, %arg6: memref<32x16xbf16, #tpu.memory_space<vmem>>, %arg7: memref<32x16xbf16, #tpu.memory_space<vmem>>, %arg8: memref<32x32xbf16, #tpu.memory_space<vmem>>, %arg9: memref<32x96xbf16, #tpu.memory_space<vmem>>, %arg10: memref<96x32xbf16, #tpu.memory_space<vmem>>, %arg11: memref<32x96xbf16, #tpu.memory_space<vmem>>, %arg12: memref<1x32xf32, #tpu.memory_space<vmem>>, %arg13: memref<1x32xf32, #tpu.memory_space<vmem>>, %arg14: memref<1x8x32xf32, #tpu.memory_space<vmem>>, %arg15: memref<8x32xbf16, #tpu.memory_space<vmem>>) attributes {dimension_semantics = [#tpu.dimension_semantics<parallel>, #tpu.dimension_semantics<arbitrary>], iteration_bounds = array<i64: 2, 1>, scalar_prefetch = 0 : i64, scratch_operands = 1 : i64, tpu.core_type = #tpu.core_type<tc>, window_params = [{transform_indices = @transform_0, window_bounds = array<i64: 1, 8, 32>}, {pipeline_mode = #tpu.pipeline_mode<synchronous>, transform_indices = @transform_1, window_bounds = array<i64: 8, 4>}, {pipeline_mode = #tpu.pipeline_mode<synchronous>, transform_indices = @transform_2, window_bounds = array<i64: 8, 4>}, {pipeline_mode = #tpu.pipeline_mode<synchronous>, transform_indices = @transform_3, window_bounds = array<i64: 32, 32>}, {pipeline_mode = #tpu.pipeline_mode<synchronous>, transform_indices = @transform_4, window_bounds = array<i64: 32, 16>}, {pipeline_mode = #tpu.pipeline_mode<synchronous>, transform_indices = @transform_5, window_bounds = array<i64: 32, 16>}, {pipeline_mode = #tpu.pipeline_mode<synchronous>, transform_indices = @transform_6, window_bounds = array<i64: 32, 32>}, {transform_indices = @transform_7, window_bounds = array<i64: 32, 96>}, {transform_indices = @transform_8, window_bounds = array<i64: 96, 32>}, {transform_indices = @transform_9, window_bounds = array<i64: 32, 96>}, {pipeline_mode = #tpu.pipeline_mode<synchronous>, transform_indices = @transform_10, window_bounds = array<i64: 1, 32>}, {pipeline_mode = #tpu.pipeline_mode<synchronous>, transform_indices = @transform_11, window_bounds = array<i64: 1, 32>}, {transform_indices = @transform_12, window_bounds = array<i64: 1, 8, 32>}]} {
    %c0_i32 = arith.constant 0 : i32
    %0 = arith.cmpi eq, %arg1, %c0_i32 : i32
    %1 = arith.extui %0 : i1 to i32
    %c0_i32_0 = arith.constant 0 : i32
    %2 = arith.cmpi ne, %1, %c0_i32_0 : i32
    scf.if %2 {
      %c0_19 = arith.constant 0 : index
      %c0_20 = arith.constant 0 : index
      %c0_21 = arith.constant 0 : index
      %26 = vector.load %arg2[%c0_19, %c0_20, %c0_21] : memref<1x8x32xf32, #tpu.memory_space<vmem>>, vector<1x8x32xf32>
      %27 = vector.shape_cast %26 : vector<1x8x32xf32> to vector<8x32xf32>
      %28 = arith.mulf %27, %27 : vector<8x32xf32>
      %cst_22 = arith.constant dense<0.000000e+00> : vector<8xf32>
      %29 = vector.multi_reduction <add>, %28, %cst_22 [1] : vector<8x32xf32> to vector<8xf32>
      %30 = vector.shape_cast %29 : vector<8xf32> to vector<8x1xf32>
      %cst_23 = arith.constant 3.200000e+01 : f32
      %31 = vector.broadcast %cst_23 : f32 to vector<8x1xf32>
      %32 = arith.divf %30, %31 : vector<8x1xf32>
      %cst_24 = arith.constant 9.99999974E-6 : f32
      %33 = vector.broadcast %cst_24 : f32 to vector<8x1xf32>
      %34 = arith.addf %32, %33 : vector<8x1xf32>
      %35 = math.rsqrt %34 : vector<8x1xf32>
      %36 = vector.broadcast %35 : vector<8x1xf32> to vector<8x32xf32>
      %37 = arith.mulf %27, %36 : vector<8x32xf32>
      %c0_25 = arith.constant 0 : index
      %c0_26 = arith.constant 0 : index
      %38 = vector.load %arg12[%c0_25, %c0_26] : memref<1x32xf32, #tpu.memory_space<vmem>>, vector<1x32xf32>
      %39 = vector.shape_cast %38 : vector<1x32xf32> to vector<32xf32>
      %40 = vector.shape_cast %39 : vector<32xf32> to vector<1x32xf32>
      %41 = vector.broadcast %40 : vector<1x32xf32> to vector<8x32xf32>
      %42 = arith.mulf %37, %41 : vector<8x32xf32>
      %43 = arith.truncf %42 : vector<8x32xf32> to vector<8x32xbf16>
      %c0_27 = arith.constant 0 : index
      %c0_28 = arith.constant 0 : index
      %44 = vector.load %arg5[%c0_27, %c0_28] : memref<32x32xbf16, #tpu.memory_space<vmem>>, vector<32x32xbf16>
      %cst_29 = arith.constant dense<0.000000e+00> : vector<8x32xf32>
      %45 = tpu.matmul %43, %44, %cst_29 {dimension_numbers = #tpu.dot_dimension_numbers<[1], [0], [0], [1], [0, 0, 1, 1], [], []>} : vector<8x32xbf16>, vector<32x32xbf16>, vector<8x32xf32> -> vector<8x32xf32>
      %c0_30 = arith.constant 0 : index
      %c0_31 = arith.constant 0 : index
      %46 = vector.load %arg6[%c0_30, %c0_31] : memref<32x16xbf16, #tpu.memory_space<vmem>>, vector<32x16xbf16>
      %cst_32 = arith.constant dense<0.000000e+00> : vector<8x16xf32>
      %47 = tpu.matmul %43, %46, %cst_32 {dimension_numbers = #tpu.dot_dimension_numbers<[1], [0], [0], [1], [0, 0, 1, 1], [], []>} : vector<8x32xbf16>, vector<32x16xbf16>, vector<8x16xf32> -> vector<8x16xf32>
      %c0_33 = arith.constant 0 : index
      %c0_34 = arith.constant 0 : index
      %48 = vector.load %arg7[%c0_33, %c0_34] : memref<32x16xbf16, #tpu.memory_space<vmem>>, vector<32x16xbf16>
      %cst_35 = arith.constant dense<0.000000e+00> : vector<8x16xf32>
      %49 = tpu.matmul %43, %48, %cst_35 {dimension_numbers = #tpu.dot_dimension_numbers<[1], [0], [0], [1], [0, 0, 1, 1], [], []>} : vector<8x32xbf16>, vector<32x16xbf16>, vector<8x16xf32> -> vector<8x16xf32>
      %c0_36 = arith.constant 0 : index
      %c0_37 = arith.constant 0 : index
      %50 = vector.load %arg3[%c0_36, %c0_37] : memref<8x4xf32, #tpu.memory_space<vmem>>, vector<8x4xf32>
      %c0_38 = arith.constant 0 : index
      %c0_39 = arith.constant 0 : index
      %51 = vector.load %arg4[%c0_38, %c0_39] : memref<8x4xf32, #tpu.memory_space<vmem>>, vector<8x4xf32>
      %cst_40 = arith.constant 0.000000e+00 : f32
      %52 = vector.broadcast %cst_40 : f32 to vector<8x32xf32>
      %53 = vector.extract_strided_slice %47 {offsets = [0, 0], sizes = [8, 8], strides = [1, 1]} : vector<8x16xf32> to vector<8x8xf32>
      %54 = vector.extract_strided_slice %53 {offsets = [0, 0], sizes = [8, 4], strides = [1, 1]} : vector<8x8xf32> to vector<8x4xf32>
      %55 = vector.extract_strided_slice %53 {offsets = [0, 4], sizes = [8, 4], strides = [1, 1]} : vector<8x8xf32> to vector<8x4xf32>
      %56 = arith.mulf %54, %50 : vector<8x4xf32>
      %57 = arith.mulf %55, %51 : vector<8x4xf32>
      %58 = arith.subf %56, %57 : vector<8x4xf32>
      %59 = arith.mulf %54, %51 : vector<8x4xf32>
      %60 = arith.mulf %55, %50 : vector<8x4xf32>
      %61 = arith.addf %59, %60 : vector<8x4xf32>
      %62 = tpu.concatenate %58, %61 in 1 : vector<8x4xf32>, vector<8x4xf32> -> vector<8x8xf32>
      %63 = arith.truncf %62 : vector<8x8xf32> to vector<8x8xbf16>
      %64 = vector.extract_strided_slice %49 {offsets = [0, 0], sizes = [8, 8], strides = [1, 1]} : vector<8x16xf32> to vector<8x8xf32>
      %65 = arith.truncf %64 : vector<8x8xf32> to vector<8x8xbf16>
      %66 = vector.extract_strided_slice %45 {offsets = [0, 0], sizes = [8, 8], strides = [1, 1]} : vector<8x32xf32> to vector<8x8xf32>
      %67 = vector.extract_strided_slice %66 {offsets = [0, 0], sizes = [8, 4], strides = [1, 1]} : vector<8x8xf32> to vector<8x4xf32>
      %68 = vector.extract_strided_slice %66 {offsets = [0, 4], sizes = [8, 4], strides = [1, 1]} : vector<8x8xf32> to vector<8x4xf32>
      %69 = arith.mulf %67, %50 : vector<8x4xf32>
      %70 = arith.mulf %68, %51 : vector<8x4xf32>
      %71 = arith.subf %69, %70 : vector<8x4xf32>
      %72 = arith.mulf %67, %51 : vector<8x4xf32>
      %73 = arith.mulf %68, %50 : vector<8x4xf32>
      %74 = arith.addf %72, %73 : vector<8x4xf32>
      %75 = tpu.concatenate %71, %74 in 1 : vector<8x4xf32>, vector<8x4xf32> -> vector<8x8xf32>
      %cst_41 = arith.constant 0.353553385 : f32
      %76 = vector.broadcast %cst_41 : f32 to vector<8x8xf32>
      %77 = arith.mulf %75, %76 : vector<8x8xf32>
      %78 = arith.truncf %77 : vector<8x8xf32> to vector<8x8xbf16>
      %cst_42 = arith.constant dense<0.000000e+00> : vector<8x8xf32>
      %79 = tpu.matmul %78, %63, %cst_42 {dimension_numbers = #tpu.dot_dimension_numbers<[1], [1], [0], [0], [0, 0, 1, 0], [], []>} : vector<8x8xbf16>, vector<8x8xbf16>, vector<8x8xf32> -> vector<8x8xf32>
      %cst_43 = arith.constant dense<0xFF800000> : vector<8xf32>
      %80 = vector.multi_reduction <maximumf>, %79, %cst_43 [1] : vector<8x8xf32> to vector<8xf32>
      %81 = vector.shape_cast %80 : vector<8xf32> to vector<8x1xf32>
      %82 = vector.broadcast %81 : vector<8x1xf32> to vector<8x8xf32>
      %83 = arith.subf %79, %82 : vector<8x8xf32>
      %84 = math.exp %83 : vector<8x8xf32>
      %cst_44 = arith.constant dense<0.000000e+00> : vector<8xf32>
      %85 = vector.multi_reduction <add>, %84, %cst_44 [1] : vector<8x8xf32> to vector<8xf32>
      %86 = vector.shape_cast %85 : vector<8xf32> to vector<8x1xf32>
      %87 = tpu.reciprocal %86 {approx = true} : vector<8x1xf32> -> vector<8x1xf32>
      %88 = vector.broadcast %87 : vector<8x1xf32> to vector<8x8xf32>
      %89 = arith.mulf %84, %88 : vector<8x8xf32>
      %90 = arith.truncf %89 : vector<8x8xf32> to vector<8x8xbf16>
      %cst_45 = arith.constant dense<0.000000e+00> : vector<8x8xf32>
      %91 = tpu.matmul %90, %65, %cst_45 {dimension_numbers = #tpu.dot_dimension_numbers<[1], [0], [0], [1], [0, 0, 1, 1], [], []>} : vector<8x8xbf16>, vector<8x8xbf16>, vector<8x8xf32> -> vector<8x8xf32>
      %92 = arith.truncf %91 : vector<8x8xf32> to vector<8x8xbf16>
      %c0_46 = arith.constant 0 : index
      %c0_47 = arith.constant 0 : index
      %93 = vector.load %arg8[%c0_46, %c0_47] : memref<32x32xbf16, #tpu.memory_space<vmem>>, vector<8x32xbf16>
      %cst_48 = arith.constant dense<0.000000e+00> : vector<8x32xf32>
      %94 = tpu.matmul %92, %93, %cst_48 {dimension_numbers = #tpu.dot_dimension_numbers<[1], [0], [0], [1], [0, 0, 1, 1], [], []>} : vector<8x8xbf16>, vector<8x32xbf16>, vector<8x32xf32> -> vector<8x32xf32>
      %95 = arith.addf %52, %94 : vector<8x32xf32>
      %96 = vector.extract_strided_slice %45 {offsets = [0, 8], sizes = [8, 8], strides = [1, 1]} : vector<8x32xf32> to vector<8x8xf32>
      %97 = vector.extract_strided_slice %96 {offsets = [0, 0], sizes = [8, 4], strides = [1, 1]} : vector<8x8xf32> to vector<8x4xf32>
      %98 = vector.extract_strided_slice %96 {offsets = [0, 4], sizes = [8, 4], strides = [1, 1]} : vector<8x8xf32> to vector<8x4xf32>
      %99 = arith.mulf %97, %50 : vector<8x4xf32>
      %100 = arith.mulf %98, %51 : vector<8x4xf32>
      %101 = arith.subf %99, %100 : vector<8x4xf32>
      %102 = arith.mulf %97, %51 : vector<8x4xf32>
      %103 = arith.mulf %98, %50 : vector<8x4xf32>
      %104 = arith.addf %102, %103 : vector<8x4xf32>
      %105 = tpu.concatenate %101, %104 in 1 : vector<8x4xf32>, vector<8x4xf32> -> vector<8x8xf32>
      %cst_49 = arith.constant 0.353553385 : f32
      %106 = vector.broadcast %cst_49 : f32 to vector<8x8xf32>
      %107 = arith.mulf %105, %106 : vector<8x8xf32>
      %108 = arith.truncf %107 : vector<8x8xf32> to vector<8x8xbf16>
      %cst_50 = arith.constant dense<0.000000e+00> : vector<8x8xf32>
      %109 = tpu.matmul %108, %63, %cst_50 {dimension_numbers = #tpu.dot_dimension_numbers<[1], [1], [0], [0], [0, 0, 1, 0], [], []>} : vector<8x8xbf16>, vector<8x8xbf16>, vector<8x8xf32> -> vector<8x8xf32>
      %cst_51 = arith.constant dense<0xFF800000> : vector<8xf32>
      %110 = vector.multi_reduction <maximumf>, %109, %cst_51 [1] : vector<8x8xf32> to vector<8xf32>
      %111 = vector.shape_cast %110 : vector<8xf32> to vector<8x1xf32>
      %112 = vector.broadcast %111 : vector<8x1xf32> to vector<8x8xf32>
      %113 = arith.subf %109, %112 : vector<8x8xf32>
      %114 = math.exp %113 : vector<8x8xf32>
      %cst_52 = arith.constant dense<0.000000e+00> : vector<8xf32>
      %115 = vector.multi_reduction <add>, %114, %cst_52 [1] : vector<8x8xf32> to vector<8xf32>
      %116 = vector.shape_cast %115 : vector<8xf32> to vector<8x1xf32>
      %117 = tpu.reciprocal %116 {approx = true} : vector<8x1xf32> -> vector<8x1xf32>
      %118 = vector.broadcast %117 : vector<8x1xf32> to vector<8x8xf32>
      %119 = arith.mulf %114, %118 : vector<8x8xf32>
      %120 = arith.truncf %119 : vector<8x8xf32> to vector<8x8xbf16>
      %cst_53 = arith.constant dense<0.000000e+00> : vector<8x8xf32>
      %121 = tpu.matmul %120, %65, %cst_53 {dimension_numbers = #tpu.dot_dimension_numbers<[1], [0], [0], [1], [0, 0, 1, 1], [], []>} : vector<8x8xbf16>, vector<8x8xbf16>, vector<8x8xf32> -> vector<8x8xf32>
      %122 = arith.truncf %121 : vector<8x8xf32> to vector<8x8xbf16>
      %c8 = arith.constant 8 : index
      %c0_54 = arith.constant 0 : index
      %123 = vector.load %arg8[%c8, %c0_54] : memref<32x32xbf16, #tpu.memory_space<vmem>>, vector<8x32xbf16>
      %cst_55 = arith.constant dense<0.000000e+00> : vector<8x32xf32>
      %124 = tpu.matmul %122, %123, %cst_55 {dimension_numbers = #tpu.dot_dimension_numbers<[1], [0], [0], [1], [0, 0, 1, 1], [], []>} : vector<8x8xbf16>, vector<8x32xbf16>, vector<8x32xf32> -> vector<8x32xf32>
      %125 = arith.addf %95, %124 : vector<8x32xf32>
      %126 = vector.extract_strided_slice %47 {offsets = [0, 8], sizes = [8, 8], strides = [1, 1]} : vector<8x16xf32> to vector<8x8xf32>
      %127 = vector.extract_strided_slice %126 {offsets = [0, 0], sizes = [8, 4], strides = [1, 1]} : vector<8x8xf32> to vector<8x4xf32>
      %128 = vector.extract_strided_slice %126 {offsets = [0, 4], sizes = [8, 4], strides = [1, 1]} : vector<8x8xf32> to vector<8x4xf32>
      %129 = arith.mulf %127, %50 : vector<8x4xf32>
      %130 = arith.mulf %128, %51 : vector<8x4xf32>
      %131 = arith.subf %129, %130 : vector<8x4xf32>
      %132 = arith.mulf %127, %51 : vector<8x4xf32>
      %133 = arith.mulf %128, %50 : vector<8x4xf32>
      %134 = arith.addf %132, %133 : vector<8x4xf32>
      %135 = tpu.concatenate %131, %134 in 1 : vector<8x4xf32>, vector<8x4xf32> -> vector<8x8xf32>
      %136 = arith.truncf %135 : vector<8x8xf32> to vector<8x8xbf16>
      %137 = vector.extract_strided_slice %49 {offsets = [0, 8], sizes = [8, 8], strides = [1, 1]} : vector<8x16xf32> to vector<8x8xf32>
      %138 = arith.truncf %137 : vector<8x8xf32> to vector<8x8xbf16>
      %139 = vector.extract_strided_slice %45 {offsets = [0, 16], sizes = [8, 8], strides = [1, 1]} : vector<8x32xf32> to vector<8x8xf32>
      %140 = vector.extract_strided_slice %139 {offsets = [0, 0], sizes = [8, 4], strides = [1, 1]} : vector<8x8xf32> to vector<8x4xf32>
      %141 = vector.extract_strided_slice %139 {offsets = [0, 4], sizes = [8, 4], strides = [1, 1]} : vector<8x8xf32> to vector<8x4xf32>
      %142 = arith.mulf %140, %50 : vector<8x4xf32>
      %143 = arith.mulf %141, %51 : vector<8x4xf32>
      %144 = arith.subf %142, %143 : vector<8x4xf32>
      %145 = arith.mulf %140, %51 : vector<8x4xf32>
      %146 = arith.mulf %141, %50 : vector<8x4xf32>
      %147 = arith.addf %145, %146 : vector<8x4xf32>
      %148 = tpu.concatenate %144, %147 in 1 : vector<8x4xf32>, vector<8x4xf32> -> vector<8x8xf32>
      %cst_56 = arith.constant 0.353553385 : f32
      %149 = vector.broadcast %cst_56 : f32 to vector<8x8xf32>
      %150 = arith.mulf %148, %149 : vector<8x8xf32>
      %151 = arith.truncf %150 : vector<8x8xf32> to vector<8x8xbf16>
      %cst_57 = arith.constant dense<0.000000e+00> : vector<8x8xf32>
      %152 = tpu.matmul %151, %136, %cst_57 {dimension_numbers = #tpu.dot_dimension_numbers<[1], [1], [0], [0], [0, 0, 1, 0], [], []>} : vector<8x8xbf16>, vector<8x8xbf16>, vector<8x8xf32> -> vector<8x8xf32>
      %cst_58 = arith.constant dense<0xFF800000> : vector<8xf32>
      %153 = vector.multi_reduction <maximumf>, %152, %cst_58 [1] : vector<8x8xf32> to vector<8xf32>
      %154 = vector.shape_cast %153 : vector<8xf32> to vector<8x1xf32>
      %155 = vector.broadcast %154 : vector<8x1xf32> to vector<8x8xf32>
      %156 = arith.subf %152, %155 : vector<8x8xf32>
      %157 = math.exp %156 : vector<8x8xf32>
      %cst_59 = arith.constant dense<0.000000e+00> : vector<8xf32>
      %158 = vector.multi_reduction <add>, %157, %cst_59 [1] : vector<8x8xf32> to vector<8xf32>
      %159 = vector.shape_cast %158 : vector<8xf32> to vector<8x1xf32>
      %160 = tpu.reciprocal %159 {approx = true} : vector<8x1xf32> -> vector<8x1xf32>
      %161 = vector.broadcast %160 : vector<8x1xf32> to vector<8x8xf32>
      %162 = arith.mulf %157, %161 : vector<8x8xf32>
      %163 = arith.truncf %162 : vector<8x8xf32> to vector<8x8xbf16>
      %cst_60 = arith.constant dense<0.000000e+00> : vector<8x8xf32>
      %164 = tpu.matmul %163, %138, %cst_60 {dimension_numbers = #tpu.dot_dimension_numbers<[1], [0], [0], [1], [0, 0, 1, 1], [], []>} : vector<8x8xbf16>, vector<8x8xbf16>, vector<8x8xf32> -> vector<8x8xf32>
      %165 = arith.truncf %164 : vector<8x8xf32> to vector<8x8xbf16>
      %c16 = arith.constant 16 : index
      %c0_61 = arith.constant 0 : index
      %166 = vector.load %arg8[%c16, %c0_61] : memref<32x32xbf16, #tpu.memory_space<vmem>>, vector<8x32xbf16>
      %cst_62 = arith.constant dense<0.000000e+00> : vector<8x32xf32>
      %167 = tpu.matmul %165, %166, %cst_62 {dimension_numbers = #tpu.dot_dimension_numbers<[1], [0], [0], [1], [0, 0, 1, 1], [], []>} : vector<8x8xbf16>, vector<8x32xbf16>, vector<8x32xf32> -> vector<8x32xf32>
      %168 = arith.addf %125, %167 : vector<8x32xf32>
      %169 = vector.extract_strided_slice %45 {offsets = [0, 24], sizes = [8, 8], strides = [1, 1]} : vector<8x32xf32> to vector<8x8xf32>
      %170 = vector.extract_strided_slice %169 {offsets = [0, 0], sizes = [8, 4], strides = [1, 1]} : vector<8x8xf32> to vector<8x4xf32>
      %171 = vector.extract_strided_slice %169 {offsets = [0, 4], sizes = [8, 4], strides = [1, 1]} : vector<8x8xf32> to vector<8x4xf32>
      %172 = arith.mulf %170, %50 : vector<8x4xf32>
      %173 = arith.mulf %171, %51 : vector<8x4xf32>
      %174 = arith.subf %172, %173 : vector<8x4xf32>
      %175 = arith.mulf %170, %51 : vector<8x4xf32>
      %176 = arith.mulf %171, %50 : vector<8x4xf32>
      %177 = arith.addf %175, %176 : vector<8x4xf32>
      %178 = tpu.concatenate %174, %177 in 1 : vector<8x4xf32>, vector<8x4xf32> -> vector<8x8xf32>
      %cst_63 = arith.constant 0.353553385 : f32
      %179 = vector.broadcast %cst_63 : f32 to vector<8x8xf32>
      %180 = arith.mulf %178, %179 : vector<8x8xf32>
      %181 = arith.truncf %180 : vector<8x8xf32> to vector<8x8xbf16>
      %cst_64 = arith.constant dense<0.000000e+00> : vector<8x8xf32>
      %182 = tpu.matmul %181, %136, %cst_64 {dimension_numbers = #tpu.dot_dimension_numbers<[1], [1], [0], [0], [0, 0, 1, 0], [], []>} : vector<8x8xbf16>, vector<8x8xbf16>, vector<8x8xf32> -> vector<8x8xf32>
      %cst_65 = arith.constant dense<0xFF800000> : vector<8xf32>
      %183 = vector.multi_reduction <maximumf>, %182, %cst_65 [1] : vector<8x8xf32> to vector<8xf32>
      %184 = vector.shape_cast %183 : vector<8xf32> to vector<8x1xf32>
      %185 = vector.broadcast %184 : vector<8x1xf32> to vector<8x8xf32>
      %186 = arith.subf %182, %185 : vector<8x8xf32>
      %187 = math.exp %186 : vector<8x8xf32>
      %cst_66 = arith.constant dense<0.000000e+00> : vector<8xf32>
      %188 = vector.multi_reduction <add>, %187, %cst_66 [1] : vector<8x8xf32> to vector<8xf32>
      %189 = vector.shape_cast %188 : vector<8xf32> to vector<8x1xf32>
      %190 = tpu.reciprocal %189 {approx = true} : vector<8x1xf32> -> vector<8x1xf32>
      %191 = vector.broadcast %190 : vector<8x1xf32> to vector<8x8xf32>
      %192 = arith.mulf %187, %191 : vector<8x8xf32>
      %193 = arith.truncf %192 : vector<8x8xf32> to vector<8x8xbf16>
      %cst_67 = arith.constant dense<0.000000e+00> : vector<8x8xf32>
      %194 = tpu.matmul %193, %138, %cst_67 {dimension_numbers = #tpu.dot_dimension_numbers<[1], [0], [0], [1], [0, 0, 1, 1], [], []>} : vector<8x8xbf16>, vector<8x8xbf16>, vector<8x8xf32> -> vector<8x8xf32>
      %195 = arith.truncf %194 : vector<8x8xf32> to vector<8x8xbf16>
      %c24 = arith.constant 24 : index
      %c0_68 = arith.constant 0 : index
      %196 = vector.load %arg8[%c24, %c0_68] : memref<32x32xbf16, #tpu.memory_space<vmem>>, vector<8x32xbf16>
      %cst_69 = arith.constant dense<0.000000e+00> : vector<8x32xf32>
      %197 = tpu.matmul %195, %196, %cst_69 {dimension_numbers = #tpu.dot_dimension_numbers<[1], [0], [0], [1], [0, 0, 1, 1], [], []>} : vector<8x8xbf16>, vector<8x32xbf16>, vector<8x32xf32> -> vector<8x32xf32>
      %198 = arith.addf %168, %197 : vector<8x32xf32>
      %199 = arith.addf %27, %198 : vector<8x32xf32>
      %c0_70 = arith.constant 0 : index
      %c0_71 = arith.constant 0 : index
      %c0_72 = arith.constant 0 : index
      %200 = vector.load %arg14[%c0_70, %c0_71, %c0_72] : memref<1x8x32xf32, #tpu.memory_space<vmem>>, vector<1x8x32xf32>
      %201 = vector.shape_cast %200 : vector<1x8x32xf32> to vector<8x32xf32>
      %202 = vector.shape_cast %199 : vector<8x32xf32> to vector<1x8x32xf32>
      tpu.vector_store %arg14[%c0_70, %c0_71, %c0_72], %202 {strides = array<i32>} : memref<1x8x32xf32, #tpu.memory_space<vmem>>, vector<1x8x32xf32>,
      %203 = arith.mulf %199, %199 : vector<8x32xf32>
      %cst_73 = arith.constant dense<0.000000e+00> : vector<8xf32>
      %204 = vector.multi_reduction <add>, %203, %cst_73 [1] : vector<8x32xf32> to vector<8xf32>
      %205 = vector.shape_cast %204 : vector<8xf32> to vector<8x1xf32>
      %cst_74 = arith.constant 3.200000e+01 : f32
      %206 = vector.broadcast %cst_74 : f32 to vector<8x1xf32>
      %207 = arith.divf %205, %206 : vector<8x1xf32>
      %cst_75 = arith.constant 9.99999974E-6 : f32
      %208 = vector.broadcast %cst_75 : f32 to vector<8x1xf32>
      %209 = arith.addf %207, %208 : vector<8x1xf32>
      %210 = math.rsqrt %209 : vector<8x1xf32>
      %211 = vector.broadcast %210 : vector<8x1xf32> to vector<8x32xf32>
      %212 = arith.mulf %199, %211 : vector<8x32xf32>
      %c0_76 = arith.constant 0 : index
      %c0_77 = arith.constant 0 : index
      %213 = vector.load %arg13[%c0_76, %c0_77] : memref<1x32xf32, #tpu.memory_space<vmem>>, vector<1x32xf32>
      %214 = vector.shape_cast %213 : vector<1x32xf32> to vector<32xf32>
      %215 = vector.shape_cast %214 : vector<32xf32> to vector<1x32xf32>
      %216 = vector.broadcast %215 : vector<1x32xf32> to vector<8x32xf32>
      %217 = arith.mulf %212, %216 : vector<8x32xf32>
      %218 = arith.truncf %217 : vector<8x32xf32> to vector<8x32xbf16>
      %c0_78 = arith.constant 0 : index
      %c0_79 = arith.constant 0 : index
      %219 = vector.load %arg15[%c0_78, %c0_79] : memref<8x32xbf16, #tpu.memory_space<vmem>>, vector<8x32xbf16>
      tpu.vector_store %arg15[%c0_78, %c0_79], %218 {strides = array<i32>} : memref<8x32xbf16, #tpu.memory_space<vmem>>, vector<8x32xbf16>,
    } else {
    }
    %c0 = arith.constant 0 : index
    %c0_1 = arith.constant 0 : index
    %3 = vector.load %arg15[%c0, %c0_1] : memref<8x32xbf16, #tpu.memory_space<vmem>>, vector<8x32xbf16>
    %c0_2 = arith.constant 0 : index
    %c0_3 = arith.constant 0 : index
    %4 = vector.load %arg9[%c0_2, %c0_3] : memref<32x96xbf16, #tpu.memory_space<vmem>>, vector<32x96xbf16>
    %cst = arith.constant dense<0.000000e+00> : vector<8x96xf32>
    %5 = tpu.matmul %3, %4, %cst {dimension_numbers = #tpu.dot_dimension_numbers<[1], [0], [0], [1], [0, 0, 1, 1], [], []>} : vector<8x32xbf16>, vector<32x96xbf16>, vector<8x96xf32> -> vector<8x96xf32>
    %c0_4 = arith.constant 0 : index
    %c0_5 = arith.constant 0 : index
    %6 = vector.load %arg11[%c0_4, %c0_5] : memref<32x96xbf16, #tpu.memory_space<vmem>>, vector<32x96xbf16>
    %cst_6 = arith.constant dense<0.000000e+00> : vector<8x96xf32>
    %7 = tpu.matmul %3, %6, %cst_6 {dimension_numbers = #tpu.dot_dimension_numbers<[1], [0], [0], [1], [0, 0, 1, 1], [], []>} : vector<8x32xbf16>, vector<32x96xbf16>, vector<8x96xf32> -> vector<8x96xf32>
    %cst_7 = arith.constant 0.000000e+00 : f32
    %8 = vector.broadcast %cst_7 : f32 to vector<8x96xf32>
    %9 = arith.subf %8, %5 : vector<8x96xf32>
    %10 = math.exp %9 : vector<8x96xf32>
    %cst_8 = arith.constant 1.000000e+00 : f32
    %11 = vector.broadcast %cst_8 : f32 to vector<8x96xf32>
    %12 = arith.addf %11, %10 : vector<8x96xf32>
    %cst_9 = arith.constant 1.000000e+00 : f32
    %13 = vector.broadcast %cst_9 : f32 to vector<8x96xf32>
    %14 = arith.divf %13, %12 : vector<8x96xf32>
    %15 = arith.mulf %5, %14 : vector<8x96xf32>
    %16 = arith.mulf %15, %7 : vector<8x96xf32>
    %17 = arith.truncf %16 : vector<8x96xf32> to vector<8x96xbf16>
    %c0_10 = arith.constant 0 : index
    %c0_11 = arith.constant 0 : index
    %c0_12 = arith.constant 0 : index
    %18 = vector.load %arg14[%c0_10, %c0_11, %c0_12] : memref<1x8x32xf32, #tpu.memory_space<vmem>>, vector<1x8x32xf32>
    %19 = vector.shape_cast %18 : vector<1x8x32xf32> to vector<8x32xf32>
    %c0_13 = arith.constant 0 : index
    %c0_14 = arith.constant 0 : index
    %20 = vector.load %arg10[%c0_13, %c0_14] : memref<96x32xbf16, #tpu.memory_space<vmem>>, vector<96x32xbf16>
    %cst_15 = arith.constant dense<0.000000e+00> : vector<8x32xf32>
    %21 = tpu.matmul %17, %20, %cst_15 {dimension_numbers = #tpu.dot_dimension_numbers<[1], [0], [0], [1], [0, 0, 1, 1], [], []>} : vector<8x96xbf16>, vector<96x32xbf16>, vector<8x32xf32> -> vector<8x32xf32>
    %22 = arith.addf %19, %21 : vector<8x32xf32>
    %c0_16 = arith.constant 0 : index
    %c0_17 = arith.constant 0 : index
    %c0_18 = arith.constant 0 : index
    %23 = vector.load %arg14[%c0_16, %c0_17, %c0_18] : memref<1x8x32xf32, #tpu.memory_space<vmem>>, vector<1x8x32xf32>
    %24 = vector.shape_cast %23 : vector<1x8x32xf32> to vector<8x32xf32>
    %25 = vector.shape_cast %22 : vector<8x32xf32> to vector<1x8x32xf32>
    tpu.vector_store %arg14[%c0_16, %c0_17, %c0_18], %25 {strides = array<i32>} : memref<1x8x32xf32, #tpu.memory_space<vmem>>, vector<1x8x32xf32>,
    return
  }
  func.func @transform_0(%arg0: i32, %arg1: i32) -> (i32, i32, i32) {
    %c0_i32 = arith.constant 0 : i32
    %c0_i32_0 = arith.constant 0 : i32
    %c0_i32_1 = arith.constant 0 : i32
    return %arg0, %c0_i32, %c0_i32_0 : i32, i32, i32
  }
  func.func @transform_1(%arg0: i32, %arg1: i32) -> (i32, i32) {
    %c0_i32 = arith.constant 0 : i32
    %c0_i32_0 = arith.constant 0 : i32
    %c0_i32_1 = arith.constant 0 : i32
    return %c0_i32, %c0_i32_0 : i32, i32
  }
  func.func @transform_2(%arg0: i32, %arg1: i32) -> (i32, i32) {
    %c0_i32 = arith.constant 0 : i32
    %c0_i32_0 = arith.constant 0 : i32
    %c0_i32_1 = arith.constant 0 : i32
    return %c0_i32, %c0_i32_0 : i32, i32
  }
  func.func @transform_3(%arg0: i32, %arg1: i32) -> (i32, i32) {
    %c0_i32 = arith.constant 0 : i32
    %c0_i32_0 = arith.constant 0 : i32
    %c0_i32_1 = arith.constant 0 : i32
    return %c0_i32, %c0_i32_0 : i32, i32
  }
  func.func @transform_4(%arg0: i32, %arg1: i32) -> (i32, i32) {
    %c0_i32 = arith.constant 0 : i32
    %c0_i32_0 = arith.constant 0 : i32
    %c0_i32_1 = arith.constant 0 : i32
    return %c0_i32, %c0_i32_0 : i32, i32
  }
  func.func @transform_5(%arg0: i32, %arg1: i32) -> (i32, i32) {
    %c0_i32 = arith.constant 0 : i32
    %c0_i32_0 = arith.constant 0 : i32
    %c0_i32_1 = arith.constant 0 : i32
    return %c0_i32, %c0_i32_0 : i32, i32
  }
  func.func @transform_6(%arg0: i32, %arg1: i32) -> (i32, i32) {
    %c0_i32 = arith.constant 0 : i32
    %c0_i32_0 = arith.constant 0 : i32
    %c0_i32_1 = arith.constant 0 : i32
    return %c0_i32, %c0_i32_0 : i32, i32
  }
  func.func @transform_7(%arg0: i32, %arg1: i32) -> (i32, i32) {
    %c0_i32 = arith.constant 0 : i32
    %c0_i32_0 = arith.constant 0 : i32
    return %c0_i32, %arg1 : i32, i32
  }
  func.func @transform_8(%arg0: i32, %arg1: i32) -> (i32, i32) {
    %c0_i32 = arith.constant 0 : i32
    %c0_i32_0 = arith.constant 0 : i32
    return %arg1, %c0_i32 : i32, i32
  }
  func.func @transform_9(%arg0: i32, %arg1: i32) -> (i32, i32) {
    %c0_i32 = arith.constant 0 : i32
    %c0_i32_0 = arith.constant 0 : i32
    return %c0_i32, %arg1 : i32, i32
  }
  func.func @transform_10(%arg0: i32, %arg1: i32) -> (i32, i32) {
    %c0_i32 = arith.constant 0 : i32
    %c0_i32_0 = arith.constant 0 : i32
    %c0_i32_1 = arith.constant 0 : i32
    return %c0_i32, %c0_i32_0 : i32, i32
  }
  func.func @transform_11(%arg0: i32, %arg1: i32) -> (i32, i32) {
    %c0_i32 = arith.constant 0 : i32
    %c0_i32_0 = arith.constant 0 : i32
    %c0_i32_1 = arith.constant 0 : i32
    return %c0_i32, %c0_i32_0 : i32, i32
  }
  func.func @transform_12(%arg0: i32, %arg1: i32) -> (i32, i32, i32) {
    %c0_i32 = arith.constant 0 : i32
    %c0_i32_0 = arith.constant 0 : i32
    %c0_i32_1 = arith.constant 0 : i32
    return %arg0, %c0_i32, %c0_i32_0 : i32, i32, i32
  }
}

</mosaic_0001>

<bundles_post_ra>
// kernel: tpu_custom_call.1
= control target key start
LH: loop header
LB: loop body
LE: loop exit
PB: predicated region body
PF: predicated region fallthrough
CT: control target
= control target key end

     0   :  { %s2734_s0 = inlined_call_operand.vmem [shape: f32[2,8,32], index: 0, kind: input, shape index: {}]   ;;  %s2735_s1 = inlined_call_operand.vmem [shape: f32[8,4], index: 1, kind: input, shape index: {}]   ;;  %s2736_s2 = inlined_call_operand.vmem [shape: f32[8,4], index: 2, kind: input, shape index: {}]   ;;  %s2737_s3 = inlined_call_operand.vmem [shape: bf16[32,32], index: 3, kind: input, shape index: {}]   ;;  %s2738_s4 = inlined_call_operand.vmem [shape: bf16[32,16], index: 4, kind: input, shape index: {}]   ;;  %s2739_s5 = inlined_call_operand.vmem [shape: bf16[32,16], index: 5, kind: input, shape index: {}]   ;;  %s2740_s6 = inlined_call_operand.vmem [shape: bf16[32,32], index: 6, kind: input, shape index: {}]   ;;  %s2741_s7 = inlined_call_operand.vmem [shape: bf16[32,96], index: 7, kind: input, shape index: {}]   ;;  %s2742_s8 = inlined_call_operand.vmem [shape: bf16[96,32], index: 8, kind: input, shape index: {}]   ;;  %s2743_s9 = inlined_call_operand.vmem [shape: bf16[32,96], index: 9, kind: input, shape index: {}]   ;;  %s2744_s10 = inlined_call_operand.vmem [shape: f32[1,32], index: 10, kind: input, shape index: {}]   ;;  %s2745_s11 = inlined_call_operand.vmem [shape: f32[1,32], index: 11, kind: input, shape index: {}]   ;;  %s2746_s12 = inlined_call_operand.hbm [shape: f32[2,8,32], index: 12, kind: output, shape index: {}]  }
   0x1   :  { %2748 = sst [smem:[#allocation6_spill]] %s2734_s0 }
   0x2   :  { %2749 = sst [smem:[#allocation7_spill]] %s2735_s1 }
   0x3   :  { %17 = vsyncpa [#allocation4], 0 }
   0x4   :  { %19 = vsyncpa [#allocation4 + $0x1], 0  ;;  %s2327_s21 = smov 0   ;;  %s2329_s22 = smov 0  }
   0x5   :  { %s2331_s23 = smov 0   ;;  %s2333_s24 = smov 0  }
   0x6   :  { %s2335_s25 = smov 0   ;;  %s2337_s26 = smov 0  }
   0x7 LB: > { %s1832_s27 = sadd.s32 4294967295, %s2244_s26   ;;  %s1833_s28 = sadd.s32 4294967294, %s2244_s26   ;;  %s2244_s26 = sphi %s2337_s26, %s25_s26   ;;  %s2240_s25 = sphi %s2335_s25, %s2759_s25   ;;  %s2236_s24 = sphi %s2333_s24, %s2758_s24   ;;  %s2232_s23 = sphi %s2331_s23, %s2757_s23   ;;  %s2228_s22 = sphi %s2329_s22, %s2756_s22   ;;  %s2224_s21 = sphi %s2327_s21, %s2755_s21  }
   0x8   : > { %s37_s29 = sadd.s32 1, %s2240_s25  ;;  %s316_s30 = sadd.s32 1, %s2232_s23 }
   0x9   : > { %p39_p0 = scmp.ge.s32.totalorder %s37_s29, 2  ;;  %p326_p1 = scmp.ne.s32.totalorder %s2232_s23, %s2228_s22 }
   0xa   : > { %p327_p2 = scmp.eq.s32.totalorder %s1832_s27, 1  ;;  %p332_p3 = scmp.ne.s32.totalorder %s2228_s22, %s2224_s21 }
   0xb   : > { %s2761_s29 = smov (%p39_p0, %s37_s29), 0  ;;  %p333_p5 = scmp.eq.s32.totalorder %s1833_s28, 1 }
   0xc   : > { %p2367_p4 = por %p327_p2, %p326_p1  ;;  %s313_s14 = ssub.s32 %s2240_s25, %s2761_s29 }
   0xd   : > { %p1839_p6 = scmp.ge.s32.totalorder %s2244_s26, 1  ;;  %p314_p7 = scmp.eq.s32.totalorder %s313_s14, 0 }
   0xe   : > { %p2374_p8 = por %p333_p5, %p332_p3  ;;  %p405_p9 = scmp.lt.s32.totalorder %s2244_s26, 3 }
   0xf   : > { %s2380_s16 = scalar_select %p314_p7, %s2232_s23, %s316_s30  }
  0x10   : > { %p406_p10 = pnand %p1839_p6, %p405_p9 }
  0x11   : > { %p459_p11 = scmp.lt.s32.totalorder (!%p406_p10), %s2236_s24, 1  ;;  %s2752_s0 = sld [smem:[#allocation6_spill]] (!%p406_p10)  ;;  %vm484_vm0 = vcmask (!%p406_p10), 261120   ;;  %v2126_v3 = vld [vmem:[%s2737_s3] sm:$0xff] (!%p406_p10)   ;;  %v2246_v4 = vmov (!%p406_p10), 0.0   ;;  %vm2247_vm1 = vmmov (!%p406_p10), 0  }
  0x12   : > { %409 = sbr.rel (%p406_p10) target bundleno = 3569 (0xdf1), region = 68  ;;  %1928 = vmatprep.subr.bf16.mxu0 (!%p406_p10), %v2246_v4  ;;  %1932 = vmatprep.mubr.msk.bf16.mxu0 (!%p406_p10), %vm2247_vm1, %v2246_v4  ;;  %v2127_v5 = vld [vmem:[%s2737_s3 + $0x8] sm:$0xff] (!%p406_p10)   ;;  %v2409_v6 = vld [vmem:[%s2736_s2] sm:$0xff] (!%p406_p10)  ;;  %s2753_s1 = sld [smem:[#allocation7_spill]] (!%p406_p10)  ;;  %vm788_vm2 = vcmask (!%p406_p10), 1043456   ;;  %vm701_vm3 = vcmask (!%p406_p10), 31744  }
  0x13   : > { %1929 = vmatpush3.bf16.msra.mxu0 (!%p406_p10), %v2126_v3  ;;  %1952 = vmatprep.subr.bf16.mxu1 (!%p406_p10), %v2246_v4  ;;  %s2248_s28 = smov (!%p406_p10), 12   ;;  %s2249_s30 = smov (!%p406_p10), 4   ;;  %v1842_v12 = vld [vmem:[%s2744_s10] ss:$0 sm:$0xff] (!%p406_p10)  ;;  %v2129_v17 = vld [vmem:[%s2738_s4 + $0x8] sm:$0xff] (!%p406_p10)   ;;  %vm726_vm4 = vcmask (!%p406_p10), 64512  }
  0x14   : > { %1930 = vmatprep.subr.bf16.mxu0 (!%p406_p10), %v2246_v4  ;;  %1954 = vmatprep.mubr.msk.bf16.mxu1 (!%p406_p10), %vm2247_vm1, %v2246_v4  ;;  %v2128_v15 = vld [vmem:[%s2738_s4] sm:$0xff] (!%p406_p10)   ;;  %v2131_v19 = vld [vmem:[%s2739_s5 + $0x8] sm:$0xff] (!%p406_p10)   ;;  %s2250_s19 = smov (!%p406_p10), 124   ;;  %s2251_s20 = smov (!%p406_p10), 8   ;;  %vm1483_vm5 = vcmask (!%p406_p10), 257024   ;;  %vm1660_vm6 = vcmask (!%p406_p10), 785408  }
  0x15   : > { %838 = vrot.lane.b32.xlu1 (!%p406_p10), %v2409_v6, %s2248_s28  ;;  %v2130_v18 = vld [vmem:[%s2739_s5] sm:$0xff] (!%p406_p10)   ;;  %s2255_s14 = smov (!%p406_p10), 112  }
  0x17   : > { %1931 = vmatpush3.bf16.msra.mxu0 (!%p406_p10), %v2127_v5 }
  0x18   : > { %1936 = vmatprep.subr.bf16.mxu0 (!%p406_p10), %v2246_v4  ;;  %v2414_v7 = vld [vmem:[%s2753_s1] sm:$0xff] (!%p406_p10) }
  0x19   : > { %s460_s17 = scalar_select %p459_p11, %s2236_s24, 1  ;;  %851 = vrot.lane.b32.xlu1 %v2414_v7, %s2248_s28 }
  0x1a   : > { %s2254_s28 = smov 16  }
  0x1b   : > { %s1841_s18 = sshll.u32 %s460_s17, 3  ;;  %s2258_s17 = smov 24  }
  0x1c   : > { %s462_s27 = scalar_lea.vmem %s2752_s0, %s1841_s18  ;;  %s2260_s18 = smov 108  }
  0x1d   : > { %v2387_v0 = vld [vmem:[%s462_s27] sm:$0xff]  ;;  %677 = vrot.lane.b32.xlu1 %v2409_v6, %s2249_s30  ;;  %s2252_s27 = smov 120  }
  0x1e   : > { %v483_v1 = vmul.f32 %v2387_v0, %v2387_v0 }
  0x20   : > { %v485_v2 = vsel %vm484_vm0, %v483_v1, 0.0 }
  0x21   : > { %486 = vadd.xlane.f32.xlu0 %v485_v2 }
  0x37   : > { %688 = vrot.lane.b32.xlu0 %v2414_v7, %s2249_s30 }
  0x87   : > { %v2451_v20 = vpop.permute.xlu1 %838 }
  0x8b   : > { %v2455_v22 = vpop.permute.xlu1 %851 }
  0x8f   : > { %v678_v27 = vpop.permute.xlu1 %677 }
  0xae   : > { %v487_v8 = vpop.xlane.xlu0 %486 }
  0xaf   : > { %v489_v9 = vmul.f32 0.03125, %v487_v8 }
  0xb1   : > { %v490_v10 = vadd.f32 1e-05, %v489_v9 }
  0xb2   : > { %v689_v28 = vpop.permute.xlu0 %688 }
  0xb3   : > { %2142 = vrsqrt.f32 %v490_v10 }
  0xbd   : > { %v2143_v11 = vpop.eup %2142 }
  0xbe   : > { %v492_v13 = vmul.f32 %v2143_v11, %v2387_v0 }
  0xc0   : > { %v500_v14 = vmul.f32 %v1842_v12, %v492_v13 }
  0xc2   : > { %v501_v16 = vpack.c.bf16 %v500_v14, %v500_v14 }
  0xc4   : > { %1933 = vmatmul.mubr.msk.bf16.vlgmr.msra.gmra.mrb[0].mxu0 %vm484_vm0, %v501_v16 }
  0xc5   : > { %1937 = vmatpush3.bf16.msra.mxu0 %v2128_v15  ;;  %1940 = vmatprep.mubr.msk.bf16.mxu0 %vm2247_vm1, %v2246_v4 }
  0xc6   : > { %1938 = vmatprep.subr.bf16.mxu0 %v2246_v4 }
  0xc9   : > { %1939 = vmatpush3.bf16.msra.mxu0 %v2129_v17 }
  0xca   : > { %1944 = vmatprep.subr.bf16.mxu0 %v2246_v4 }
  0xcc   : > { %1941 = vmatmul.mubr.msk.bf16.vlgmr.msra.gmra.mrb[4].mxu0 %vm484_vm0, %v501_v16 }
  0xcd   : > { %1945 = vmatpush3.bf16.msra.mxu0 %v2130_v18  ;;  %1948 = vmatprep.mubr.msk.bf16.mxu0 %vm2247_vm1, %v2246_v4 }
  0xce   : > { %1946 = vmatprep.subr.bf16.mxu0 %v2246_v4 }
  0xd1   : > { %1947 = vmatpush3.bf16.msra.mxu0 %v2131_v19 }
  0xd2   : > { %1958 = vmatprep.subr.bf16.mxu0 %v2246_v4 }
  0xd4   : > { %1949 = vmatmul.mubr.msk.bf16.vlgmr.msra.gmra.mrb[8].mxu0 %vm484_vm0, %v501_v16 }
  0xd5   : > { %1960 = vmatprep.mubr.msk.bf16.mxu0 %vm2247_vm1, %v2246_v4 }
 0x197   : > { %v2453_v21 = vpop.f32.mrb[0].mxu0 }
 0x198   : > { %v1934_v23 = vpop.f32.mrb[1].mxu0  ;;  %v841_v24 = vmul.f32 %v2451_v20, %v2453_v21  ;;  %v713_v35 = vmul.f32 %v689_v28, %v2453_v21  ;;  %v706_v36 = vmul.f32 %v678_v27, %v2453_v21  ;;  %v854_v43 = vmul.f32 %v2455_v22, %v2453_v21 }
 0x199   : > { %v558_v25 = vpop.f32.mrb[2].mxu0  ;;  %v712_v47 = vmul.f32 %v2409_v6, %v2453_v21  ;;  %v705_v2 = vmul.f32 %v2414_v7, %v2453_v21 }
 0x19a   : > { %843 = vrot.lane.b32.xlu0 %v841_v24, %s2250_s19  ;;  %v1935_v26 = vpop.f32.mrb[3].mxu0 }
 0x19f   : > { %v2460_v29 = vpop.f32.mrb[4].mxu0 }
 0x1a0   : > { %v1942_v30 = vpop.f32.mrb[5].mxu0  ;;  %v680_v31 = vmul.f32 %v678_v27, %v2460_v29  ;;  %v691_v32 = vmul.f32 %v689_v28, %v2460_v29  ;;  %v686_v44 = vmul.f32 %v2409_v6, %v2460_v29  ;;  %v675_v61 = vmul.f32 %v2414_v7, %v2460_v29 }
 0x1a1   : > { %v614_v33 = vpop.f32.mrb[6].mxu0 }
 0x1a2   : > { %682 = vrot.lane.b32.xlu0 %v680_v31, %s2250_s19  ;;  %v1943_v34 = vpop.f32.mrb[7].mxu0  ;;  %693 = vrot.lane.b32.xlu1 %v691_v32, %s2250_s19  ;;  %v1064_v33 = vmul.f32 %v2451_v20, %v2460_v29 }
 0x1a3   : > { %v1071_v34 = vmul.f32 %v2455_v22, %v2460_v29 }
 0x1a6   : > { %708 = vrot.lane.b32.xlu0 %v706_v36, %s2250_s19  ;;  %715 = vrot.lane.b32.xlu1 %v713_v35, %s2250_s19 }
 0x1a7   : > { %v667_v37 = vpop.f32.mrb[8].mxu0 }
 0x1a8   : > { %v2470_v38 = vpack.c.bf16 %v667_v37, %v667_v37  ;;  %v1950_v39 = vpop.f32.mrb[9].mxu0 }
 0x1a9   : > { %v670_v40 = vpop.f32.mrb[10].mxu0 }
 0x1aa   : > { %v2474_v41 = vsel %vm788_vm2, %v2470_v38, 0  ;;  %v1951_v42 = vpop.f32.mrb[11].mxu0  ;;  %834 = vrot.lane.b32.xlu1 %v2414_v7, %s2251_s20 }
 0x1ab   : > { %1959 = vmatpush3.bf16.msra.mxu0 %v2474_v41 }
 0x1ac   : > { %1970 = vmatprep.subr.bf16.mxu0 %v2246_v4 }
 0x1ae   : > { %847 = vrot.lane.b32.xlu1 %v2409_v6, %s2251_s20 }
 0x1b2   : > { %856 = vrot.lane.b32.xlu1 %v854_v43, %s2250_s19 }
 0x20c   : > { %v844_v53 = vpop.permute.xlu0 %843 }
 0x214   : > { %v694_v45 = vpop.permute.xlu1 %693  ;;  %v683_v60 = vpop.permute.xlu0 %682 }
 0x215   : > { %v696_v46 = vadd.f32 %v694_v45, %v686_v44  ;;  %v685_v62 = vsub.f32 %v675_v61, %v683_v60 }
 0x217   : > { %698 = vrot.lane.b32.xlu1 %v696_v46, %s2249_s30 }
 0x218   : > { %v716_v48 = vpop.permute.xlu1 %715  ;;  %v709_v63 = vpop.permute.xlu0 %708 }
 0x219   : > { %v718_v49 = vadd.f32 %v716_v48, %v712_v47  ;;  %v711_v8 = vsub.f32 %v705_v2, %v709_v63  ;;  %v970_v2 = vld [vmem:[%s2740_s6 + $0x4] sm:$0xf] }
 0x21b   : > { %720 = vrot.lane.b32.xlu1 %v718_v49, %s2249_s30  ;;  %s2253_s30 = smov 20  }
 0x21c   : > { %v835_v50 = vpop.permute.xlu1 %834 }
 0x21d   : > { %v837_v51 = vmul.f32 %v835_v50, %v2453_v21  ;;  %v2491_v52 = vmul.f32 %v835_v50, %v2460_v29 }
 0x21f   : > { %v846_v54 = vsub.f32 %v837_v51, %v844_v53 }
 0x220   : > { %v848_v55 = vpop.permute.xlu1 %847 }
 0x221   : > { %v2494_v56 = vmul.f32 %v848_v55, %v2460_v29  ;;  %861 = vrot.lane.b32.xlu0 %v846_v54, %s2252_s27  ;;  %v850_v57 = vmul.f32 %v848_v55, %v2453_v21 }
 0x224   : > { %v857_v58 = vpop.permute.xlu1 %856 }
 0x225   : > { %v859_v59 = vadd.f32 %v857_v58, %v850_v57 }
 0x227   : > { %865 = vrot.lane.b32.xlu1 %v859_v59, %s2250_s19 }
 0x289   : > { %v699_v1 = vpop.permute.xlu1 %698 }
 0x28a   : > { %v702_v3 = vsel %vm701_vm3, %v685_v62, %v699_v1 }
 0x28b   : > { %v703_v5 = vpack.c.bf16 %v702_v3, %v702_v3  ;;  %v975_v3 = vsel %vm788_vm2, %v970_v2, 0 }
 0x28d   : > { %v721_v9 = vpop.permute.xlu1 %720  ;;  %v731_v10 = vsel %vm726_vm4, %v703_v5, 0 }
 0x28e   : > { %v723_v11 = vsel %vm701_vm3, %v711_v8, %v721_v9  ;;  %1953 = vmatpush3.bf16.xpose.msra.mxu1 %v731_v10 }
 0x28f   : > { %v724_v12 = vmul.f32 0.35355338, %v723_v11  ;;  %1964 = vmatprep.subr.bf16.mxu1 %v2246_v4 }
 0x291   : > { %v725_v13 = vpack.c.bf16 %v724_v12, %v724_v12 }
 0x293   : > { %v862_v14 = vpop.permute.xlu0 %861 }
 0x295   : > { %1955 = vmatmul.mubr.msk.bf16.vlgmr.msra.gmra.mrb[0].mxu1 %vm726_vm4, %v725_v13 }
 0x296   : > { %1965 = vmatpush3.bf16.xpose.msra.mxu1 %v731_v10  ;;  %1966 = vmatprep.mubr.msk.bf16.mxu1 %vm2247_vm1, %v2246_v4 }
 0x297   : > { %1976 = vmatprep.subr.bf16.mxu1 %v2246_v4 }
 0x299   : > { %v866_v15 = vpop.permute.xlu1 %865 }
 0x29a   : > { %v868_v16 = vsel %vm701_vm3, %v862_v14, %v866_v15 }
 0x29b   : > { %v869_v17 = vmul.f32 0.35355338, %v868_v16 }
 0x29d   : > { %v870_v18 = vpack.c.bf16 %v869_v17, %v869_v17 }
 0x29f   : > { %1967 = vmatmul.mubr.msk.bf16.vlgmr.msra.gmra.mrb[4].mxu1 %vm726_vm4, %v870_v18 }
 0x2a0   : > { %1978 = vmatprep.mubr.msk.bf16.mxu1 %vm2247_vm1, %v2246_v4  ;;  %1977 = vmatpush3.bf16.msra.mxu1 %v975_v3 }
 0x2a1   : > { %1988 = vmatprep.subr.bf16.mxu1 %v2246_v4 }
 0x368   : > { %v767_v19 = vpop.f32.mrb[0].mxu1 }
 0x369   : > { %v1956_v23 = vpop.f32.mrb[1].mxu1  ;;  %v773_v24 = vsel %vm726_vm4, %v767_v19, -inf }
 0x36a   : > { %774 = vmax.xlane.f32.xlu0 %v773_v24  ;;  %v770_v25 = vpop.f32.mrb[2].mxu1 }
 0x36b   : > { %v1957_v26 = vpop.f32.mrb[3].mxu1 }
 0x372   : > { %v908_v27 = vpop.f32.mrb[4].mxu1 }
 0x373   : > { %v1968_v28 = vpop.f32.mrb[5].mxu1  ;;  %v914_v30 = vsel %vm726_vm4, %v908_v27, -inf }
 0x374   : > { %915 = vmax.xlane.f32.xlu1 %v914_v30  ;;  %v911_v31 = vpop.f32.mrb[6].mxu1 }
 0x375   : > { %v1969_v32 = vpop.f32.mrb[7].mxu1 }
 0x385   : > { %1091 = vrot.lane.b32.xlu1 %v2409_v6, %s2253_s30 }
 0x389   : > { %1066 = vrot.lane.b32.xlu1 %v1064_v33, %s2250_s19 }
 0x38d   : > { %1073 = vrot.lane.b32.xlu1 %v1071_v34, %s2250_s19 }
 0x391   : > { %1100 = vrot.lane.b32.xlu1 %v2409_v6, %s2254_s28 }
 0x3f7   : > { %v775_v35 = vpop.xlane.xlu0 %774 }
 0x3f8   : > { %v776_v36 = vsub.f32 %v767_v19, %v775_v35 }
 0x3fa   : > { %v777_v37 = vmul.f32 1.442695, %v776_v36 }
 0x3fc   : > { %2144 = vpow2.f32 %v777_v37 }
 0x401   : > { %v916_v39 = vpop.xlane.xlu1 %915 }
 0x402   : > { %v917_v40 = vsub.f32 %v908_v27, %v916_v39 }
 0x404   : > { %v918_v42 = vmul.f32 1.442695, %v917_v40 }
 0x405   : > { %v1092_v29 = vpop.permute.xlu1 %1091 }
 0x406   : > { %v2145_v43 = vpop.eup %2144  ;;  %2146 = vpow2.f32 %v918_v42  ;;  %v1094_v45 = vmul.f32 %v1092_v29, %v2453_v21 }
 0x407   : > { %v779_v20 = vsel %vm726_vm4, %v2145_v43, 0.0 }
 0x408   : > { %780 = vadd.xlane.f32.xlu0 %v779_v20 }
 0x409   : > { %v1067_v46 = vpop.permute.xlu1 %1066 }
 0x40a   : > { %v1069_v47 = vsub.f32 %v2491_v52, %v1067_v46 }
 0x40d   : > { %v1074_v57 = vpop.permute.xlu1 %1073 }
 0x40e   : > { %v1076_v58 = vadd.f32 %v1074_v57, %v2494_v56 }
 0x410   : > { %v2147_v44 = vpop.eup %2146 }
 0x411   : > { %v920_v22 = vsel %vm726_vm4, %v2147_v44, 0.0  ;;  %v1101_v5 = vpop.permute.xlu1 %1100 }
 0x412   : > { %921 = vadd.xlane.f32.xlu0 %v920_v22  ;;  %v1103_v8 = vmul.f32 %v1101_v5, %v2453_v21 }
 0x428   : > { %1104 = vrot.lane.b32.xlu0 %v2414_v7, %s2253_s30  ;;  %s2261_s30 = smov [#allocation3]  }
 0x42c   : > { %1087 = vrot.lane.b32.xlu0 %v2414_v7, %s2254_s28  ;;  %s2256_s28 = smov 116  }
 0x430   : > { %1096 = vrot.lane.b32.xlu0 %v1094_v45, %s2250_s19 }
 0x434   : > { %1078 = vrot.lane.b32.xlu0 %v1069_v47, %s2252_s27 }
 0x495   : > { %v781_v48 = vpop.xlane.xlu0 %780 }
 0x496   : > { %2148 = vrcp.f32 %v781_v48 }
 0x49f   : > { %v922_v49 = vpop.xlane.xlu0 %921 }
 0x4a0   : > { %v2149_v50 = vpop.eup %2148  ;;  %2150 = vrcp.f32 %v922_v49 }
 0x4a1   : > { %v783_v51 = vmul.f32 %v2149_v50, %v2145_v43 }
 0x4a3   : > { %v1105_v53 = vpop.permute.xlu0 %1104  ;;  %v784_v54 = vpack.c.bf16 %v783_v51, %v783_v51 }
 0x4a4   : > { %v1107_v55 = vmul.f32 %v1105_v53, %v2453_v21 }
 0x4a5   : > { %1961 = vmatmul.mubr.msk.bf16.vlgmr.msra.gmra.mrb[12].mxu0 %vm726_vm4, %v784_v54 }
 0x4a6   : > { %1971 = vmatpush3.bf16.msra.mxu0 %v2474_v41  ;;  %1109 = vrot.lane.b32.xlu1 %v1107_v55, %s2250_s19  ;;  %v833_v41 = vld [vmem:[%s2740_s6] sm:$0xf] }
 0x4a7   : > { %v1088_v52 = vpop.permute.xlu0 %1087  ;;  %1972 = vmatprep.mubr.msk.bf16.mxu0 %vm2247_vm1, %v2246_v4  ;;  %1982 = vmatprep.subr.bf16.mxu0 %v2246_v4  ;;  %v1021_v56 = vsel %vm788_vm2, %v833_v41, 0 }
 0x4a8   : > { %v1090_v60 = vmul.f32 %v1088_v52, %v2453_v21 }
 0x4aa   : > { %v2151_v59 = vpop.eup %2150  ;;  %1082 = vrot.lane.b32.xlu1 %v1076_v58, %s2250_s19 }
 0x4ab   : > { %v924_v61 = vmul.f32 %v2151_v59, %v2147_v44  ;;  %v1097_v62 = vpop.permute.xlu0 %1096 }
 0x4ac   : > { %v1099_v63 = vsub.f32 %v1090_v60, %v1097_v62 }
 0x4ad   : > { %v925_v1 = vpack.c.bf16 %v924_v61, %v924_v61 }
 0x4ae   : > { %1114 = vrot.lane.b32.xlu0 %v1099_v63, %s2255_s14  ;;  %s2257_s14 = smov 28  }
 0x4af   : > { %1973 = vmatmul.mubr.msk.bf16.vlgmr.msra.gmra.mrb[16].mxu0 %vm726_vm4, %v925_v1  ;;  %v1079_v17 = vpop.permute.xlu0 %1078 }
 0x4b0   : > { %1984 = vmatprep.mubr.msk.bf16.mxu0 %vm2247_vm1, %v2246_v4  ;;  %1983 = vmatpush3.bf16.msra.mxu0 %v1021_v56 }
 0x4b1   : > { %1994 = vmatprep.subr.bf16.mxu0 %v2246_v4 }
 0x518   : > { %v1110_v9 = vpop.permute.xlu1 %1109 }
 0x519   : > { %v1112_v10 = vadd.f32 %v1110_v9, %v1103_v8 }
 0x51b   : > { %1118 = vrot.lane.b32.xlu1 %v1112_v10, %s2256_s28  ;;  %s1879_s28 = sshll.u32 %s2236_s24, 7  ;;  %s2754_s24 = sand.u32 1, %s2228_s22  }
 0x51c   : > { %v1083_v15 = vpop.permute.xlu1 %1082  ;;  %s2683_s0 = scalar_lea.hbm %s2746_s12, %s1879_s28 }
 0x51d   : > { %v1085_v18 = vsel %vm701_vm3, %v1079_v17, %v1083_v15 }
 0x51e   : > { %v1086_v19 = vpack.c.bf16 %v1085_v18, %v1085_v18 }
 0x51f   : > { %1284 = vrot.lane.b32.xlu1 %v2409_v6, %s2257_s14 }
 0x520   : > { %v2567_v26 = vsel %vm726_vm4, %v1086_v19, 0  ;;  %v1115_v27 = vpop.permute.xlu0 %1114 }
 0x523   : > { %1297 = vrot.lane.b32.xlu1 %v2414_v7, %s2257_s14  ;;  %s2747_s14 = sand.u32 1, %s2228_s22  }
 0x527   : > { %1280 = vrot.lane.b32.xlu1 %v2414_v7, %s2258_s17 }
 0x52b   : > { %1293 = vrot.lane.b32.xlu1 %v2409_v6, %s2258_s17  ;;  %s1840_s17 = sshll.u32 %s2747_s14, 3 }
 0x578   : > { %v826_v11 = vpop.f32.mrb[12].mxu0 }
 0x579   : > { %v832_v12 = vpack.c.bf16 %v826_v11, %v826_v11  ;;  %v1962_v13 = vpop.f32.mrb[13].mxu0 }
 0x57a   : > { %v829_v14 = vpop.f32.mrb[14].mxu0 }
 0x57b   : > { %v1963_v16 = vpop.f32.mrb[15].mxu0  ;;  %1985 = vmatmul.mubr.msk.bf16.vlgmr.msra.gmra.mrb[20].mxu0 %vm726_vm4, %v832_v12 }
 0x57c   : > { %1996 = vmatprep.mubr.msk.bf16.mxu0 %vm2247_vm1, %v2246_v4 }
 0x582   : > { %v963_v23 = vpop.f32.mrb[16].mxu0 }
 0x583   : > { %v969_v24 = vpack.c.bf16 %v963_v23, %v963_v23  ;;  %v1974_v7 = vpop.f32.mrb[17].mxu0 }
 0x584   : > { %v966_v25 = vpop.f32.mrb[18].mxu0 }
 0x585   : > { %v1975_v6 = vpop.f32.mrb[19].mxu0  ;;  %1979 = vmatmul.mubr.msk.bf16.vlgmr.msra.gmra.mrb[8].mxu1 %vm726_vm4, %v969_v24 }
 0x586   : > { %1989 = vmatpush3.bf16.xpose.msra.mxu1 %v2567_v26  ;;  %1990 = vmatprep.mubr.msk.bf16.mxu1 %vm2247_vm1, %v2246_v4 }
 0x587   : > { %2000 = vmatprep.subr.bf16.mxu1 %v2246_v4 }
 0x58d   : > { %v1119_v28 = vpop.permute.xlu1 %1118 }
 0x58e   : > { %v1121_v30 = vsel %vm701_vm3, %v1115_v27, %v1119_v28 }
 0x58f   : > { %v1122_v31 = vmul.f32 0.35355338, %v1121_v30  ;;  %v1416_v30 = vld [vmem:[%s2740_s6 + $0xc] sm:$0xf] }
 0x591   : > { %v1123_v32 = vpack.c.bf16 %v1122_v31, %v1122_v31  ;;  %v1285_v33 = vpop.permute.xlu1 %1284  ;;  %v1421_v31 = vsel %vm788_vm2, %v1416_v30, 0 }
 0x592   : > { %v1287_v34 = vmul.f32 %v1285_v33, %v2453_v21 }
 0x593   : > { %1991 = vmatmul.mubr.msk.bf16.vlgmr.msra.gmra.mrb[12].mxu1 %vm726_vm4, %v1123_v32 }
 0x594   : > { %1289 = vrot.lane.b32.xlu1 %v1287_v34, %s2250_s19  ;;  %2002 = vmatprep.mubr.msk.bf16.mxu1 %vm2247_vm1, %v2246_v4 }
 0x595   : > { %v1298_v35 = vpop.permute.xlu1 %1297 }
 0x596   : > { %v1300_v36 = vmul.f32 %v1298_v35, %v2453_v21 }
 0x598   : > { %1302 = vrot.lane.b32.xlu1 %v1300_v36, %s2250_s19  ;;  %s2259_s19 = smov 104  }
 0x599   : > { %v1281_v50 = vpop.permute.xlu1 %1280 }
 0x59a   : > { %v1283_v54 = vmul.f32 %v1281_v50, %v2453_v21 }
 0x59d   : > { %v1294_v51 = vpop.permute.xlu1 %1293 }
 0x59e   : > { %v1296_v52 = vmul.f32 %v1294_v51, %v2453_v21  ;;  %v1232_v21 = vld [vmem:[%s2740_s6 + $0x8] sm:$0xf] }
 0x59f   : > { %v1237_v41 = vsel %vm788_vm2, %v1232_v21, 0  ;;  %v2136_v21 = vld [vmem:[%s2742_s8] sm:$0xff]  }
 0x5a0   : > { %2001 = vmatpush3.bf16.msra.mxu1 %v1237_v41  ;;  %v2137_v41 = vld [vmem:[%s2742_s8 + $0x8] sm:$0xff]  }
 0x5a1   : > { %2012 = vmatprep.subr.bf16.mxu1 %v2246_v4 }
 0x606   : > { %v1290_v53 = vpop.permute.xlu1 %1289 }
 0x607   : > { %v1292_v55 = vsub.f32 %v1283_v54, %v1290_v53  ;;  %v2132_v54 = vld [vmem:[%s2741_s7] sm:$0xff]  }
 0x60a   : > { %v1303_v57 = vpop.permute.xlu1 %1302 }
 0x60b   : > { %v1305_v58 = vadd.f32 %v1303_v57, %v1296_v52  ;;  %v2135_v57 = vld [vmem:[%s2743_s9 + $0x8] sm:$0xff]  }
 0x64e   : > { %v1057_v37 = vpop.f32.mrb[20].mxu0 }
 0x64f   : > { %v1986_v39 = vpop.f32.mrb[21].mxu0 }
 0x650   : > { %v1060_v40 = vpop.f32.mrb[22].mxu0 }
 0x651   : > { %v1987_v42 = vpop.f32.mrb[23].mxu0 }
 0x658   : > { %v1011_v43 = vpop.f32.mrb[8].mxu1 }
 0x659   : > { %v2581_v20 = vadd.f32 %v1057_v37, %v1011_v43  ;;  %v1980_v44 = vpop.f32.mrb[9].mxu1 }
 0x65a   : > { %v1014_v22 = vpop.f32.mrb[10].mxu1 }
 0x65b   : > { %v1981_v29 = vpop.f32.mrb[11].mxu1 }
 0x666   : > { %v1164_v45 = vpop.f32.mrb[12].mxu1 }
 0x667   : > { %v1992_v46 = vpop.f32.mrb[13].mxu1  ;;  %v1170_v47 = vsel %vm726_vm4, %v1164_v45, -inf }
 0x668   : > { %1171 = vmax.xlane.f32.xlu0 %v1170_v47  ;;  %v1167_v48 = vpop.f32.mrb[14].mxu1 }
 0x669   : > { %v1993_v49 = vpop.f32.mrb[15].mxu1 }
 0x67e   : > { %1183 = vrot.lane.b32.xlu0 %v2470_v38, %s2252_s27  ;;  %s1707_s27 = scalar_lea.sflag [#allocation4], %s2754_s24 }
 0x682   : > { %1307 = vrot.lane.b32.xlu0 %v1292_v55, %s2259_s19  ;;  %s2627_s19 = scalar_lea.vmem [#allocation3], %s1840_s17  ;;  %v2133_v55 = vld [vmem:[%s2743_s9] sm:$0xff]  }
 0x683   : > { %s1720_s17 = sshll.u32 %s2627_s19, 4  ;;  %s2685_s17 = int_to_ptr.vmem [resolvable:$true] %s1720_s17 }
 0x684   : > { %s2166_s20 = scalar_lea.vmem %s2685_s17, 128 }
 0x685   : > { %p2167_p12 = scmp.ne.s32.totalorder %s2685_s17, %s2166_s20 }
 0x686   : > { %1311 = vrot.lane.b32.xlu0 %v1305_v58, %s2260_s18  ;;  %s2170_s18 = sshll.u32 %s2261_s30, 4  ;;  %s2171_s18 = int_to_ptr.vmem [resolvable:$false] %s2170_s18 }
 0x687   : > { %p2168_p13 = pnand %p2167_p12, %p2367_p4  ;;  %s2172_s28 = scalar_lea.vmem %s2171_s18, 256 }
 0x688   : > { %p2173_p1 = scmp.lt.s32.totalorder %s2685_s17, %s2171_s18  ;;  %p2174_p2 = scmp.lt.s32.totalorder %s2172_s28, %s2166_s20 }
 0x689   : > { %p2169_p0 = pneg %p2168_p13 }
 0x68a   : > { %p2175_p3 = por %p2174_p2, %p2173_p1 }
 0x68c   : > { %p2176_p5 = pnand %p2175_p3, %p2169_p0 }
 0x6f5   : > { %v1172_v59 = vpop.xlane.xlu0 %1171 }
 0x6f6   : > { %v1173_v60 = vsub.f32 %v1164_v45, %v1172_v59 }
 0x6f8   : > { %v1174_v61 = vmul.f32 1.442695, %v1173_v60 }
 0x6f9   : > { %v1184_v62 = vpop.permute.xlu0 %1183 }
 0x6fa   : > { %2152 = vpow2.f32 %v1174_v61  ;;  %v1189_v63 = vsel %vm788_vm2, %v1184_v62, 0  ;;  %v1864_v61 = vld [vmem:[%s2745_s11] ss:$0 sm:$0xff] }
 0x6fb   : > { %1995 = vmatpush3.bf16.msra.mxu0 %v1189_v63 }
 0x6fc   : > { %2006 = vmatprep.subr.bf16.mxu0 %v2246_v4 }
 0x6fd   : > { %v1308_v2 = vpop.permute.xlu0 %1307 }
 0x701   : > { %v1312_v5 = vpop.permute.xlu0 %1311 }
 0x702   : > { %v1314_v10 = vsel %vm701_vm3, %v1308_v2, %v1312_v5  ;;  %v2139_v2 = vld [vmem:[%s2742_s8 + $0x18] sm:$0xff]   ;;  %v2141_v5 = vld [vmem:[%s2742_s8 + $0x28] sm:$0xff]  }
 0x703   : > { %v1315_v11 = vmul.f32 0.35355338, %v1314_v10 }
 0x704   : > { %v2153_v38 = vpop.eup %2152 }
 0x705   : > { %v1176_v1 = vsel %vm726_vm4, %v2153_v38, 0.0  ;;  %v1316_v12 = vpack.c.bf16 %v1315_v11, %v1315_v11 }
 0x706   : > { %1177 = vadd.xlane.f32.xlu1 %v1176_v1 }
 0x793   : > { %v1178_v56 = vpop.xlane.xlu1 %1177 }
 0x794   : > { %2154 = vrcp.f32 %v1178_v56  ;;  %v2138_v56 = vld [vmem:[%s2742_s8 + $0x10] sm:$0xff]  }
 0x79e   : > { %v2155_v3 = vpop.eup %2154 }
 0x79f   : > { %v1180_v8 = vmul.f32 %v2155_v3, %v2153_v38  ;;  %v2140_v3 = vld [vmem:[%s2742_s8 + $0x20] sm:$0xff]  }
 0x7a1   : > { %v1181_v9 = vpack.c.bf16 %v1180_v8, %v1180_v8 }
 0x7a3   : > { %1997 = vmatmul.mubr.msk.bf16.vlgmr.msra.gmra.mrb[24].mxu0 %vm726_vm4, %v1181_v9 }
 0x7a4   : > { %2007 = vmatpush3.bf16.xpose.msra.mxu0 %v2567_v26  ;;  %2008 = vmatprep.mubr.msk.bf16.mxu0 %vm2247_vm1, %v2246_v4 }
 0x7a5   : > { %2018 = vmatprep.subr.bf16.mxu0 %v2246_v4 }
 0x7ab   : > { %2009 = vmatmul.mubr.msk.bf16.vlgmr.msra.gmra.mrb[28].mxu0 %vm726_vm4, %v1316_v12 }
 0x7ac   : > { %2020 = vmatprep.mubr.msk.bf16.mxu0 %vm2247_vm1, %v2246_v4  ;;  %2019 = vmatpush3.bf16.msra.mxu0 %v1421_v31 }
 0x7ad   : > { %2032 = vmatprep.subr.bf16.mxu0 %v2246_v4 }
 0x876   : > { %v1225_v13 = vpop.f32.mrb[24].mxu0 }
 0x877   : > { %v1231_v14 = vpack.c.bf16 %v1225_v13, %v1225_v13  ;;  %v1998_v15 = vpop.f32.mrb[25].mxu0 }
 0x878   : > { %v1228_v16 = vpop.f32.mrb[26].mxu0 }
 0x879   : > { %v1999_v17 = vpop.f32.mrb[27].mxu0  ;;  %2003 = vmatmul.mubr.msk.bf16.vlgmr.msra.gmra.mrb[16].mxu1 %vm726_vm4, %v1231_v14 }
 0x87a   : > { %2013 = vmatpush3.bf16.msra.mxu1 %v1189_v63  ;;  %2014 = vmatprep.mubr.msk.bf16.mxu1 %vm2247_vm1, %v2246_v4 }
 0x87b   : > { %2024 = vmatprep.subr.bf16.mxu1 %v2246_v4 }
 0x87e   : > { %v1354_v18 = vpop.f32.mrb[28].mxu0 }
 0x87f   : > { %v2010_v19 = vpop.f32.mrb[29].mxu0  ;;  %v1360_v23 = vsel %vm726_vm4, %v1354_v18, -inf }
 0x880   : > { %1361 = vmax.xlane.f32.xlu0 %v1360_v23  ;;  %v1357_v24 = vpop.f32.mrb[30].mxu0 }
 0x881   : > { %v2011_v7 = vpop.f32.mrb[31].mxu0 }
 0x90d   : > { %v1362_v25 = vpop.xlane.xlu0 %1361 }
 0x90e   : > { %v1363_v6 = vsub.f32 %v1354_v18, %v1362_v25 }
 0x910   : > { %v1364_v26 = vmul.f32 1.442695, %v1363_v6 }
 0x912   : > { %2156 = vpow2.f32 %v1364_v26 }
 0x91c   : > { %v2157_v27 = vpop.eup %2156 }
 0x91d   : > { %v1366_v28 = vsel %vm726_vm4, %v2157_v27, 0.0 }
 0x91e   : > { %1367 = vadd.xlane.f32.xlu1 %v1366_v28 }
 0x94c   : > { %v1273_v32 = vpop.f32.mrb[16].mxu1 }
 0x94d   : > { %v1279_v33 = vadd.f32 %v1273_v32, %v2581_v20  ;;  %v2004_v34 = vpop.f32.mrb[17].mxu1 }
 0x94e   : > { %v1276_v35 = vpop.f32.mrb[18].mxu1 }
 0x94f   : > { %v2005_v36 = vpop.f32.mrb[19].mxu1 }
 0x9ab   : > { %v1368_v37 = vpop.xlane.xlu1 %1367 }
 0x9ac   : > { %2158 = vrcp.f32 %v1368_v37 }
 0x9b6   : > { %v2159_v39 = vpop.eup %2158 }
 0x9b7   : > { %v1370_v40 = vmul.f32 %v2159_v39, %v2157_v27 }
 0x9b9   : > { %v1371_v42 = vpack.c.bf16 %v1370_v40, %v1370_v40 }
 0x9bb   : > { %2015 = vmatmul.mubr.msk.bf16.vlgmr.msra.gmra.mrb[20].mxu1 %vm726_vm4, %v1371_v42 }
 0x9bc   : > { %2028 = vmatprep.mubr.msk.bf16.mxu1 %vm2247_vm1, %v2246_v4  ;;  %2025 = vmatpush3.bf16.msra.mxu1 %v2132_v54 }
 0x9bd   : > { %2026 = vmatprep.subr.bf16.mxu1 %v2246_v4 }
 0xa8e   : > { %v1409_v43 = vpop.f32.mrb[20].mxu1 }
 0xa8f   : > { %v1415_v44 = vpack.c.bf16 %v1409_v43, %v1409_v43  ;;  %v2016_v22 = vpop.f32.mrb[21].mxu1 }
 0xa90   : > { %v1412_v29 = vpop.f32.mrb[22].mxu1 }
 0xa91   : > { %v2017_v20 = vpop.f32.mrb[23].mxu1  ;;  %2021 = vmatmul.mubr.msk.bf16.vlgmr.msra.gmra.mrb[32].mxu0 %vm726_vm4, %v1415_v44 }
 0xa92   : > { %2036 = vmatprep.mubr.msk.bf16.mxu0 %vm2247_vm1, %v2246_v4  ;;  %2033 = vmatpush3.bf16.msra.mxu0 %v2133_v55 }
 0xa93   : > { %2034 = vmatprep.subr.bf16.mxu0 %v2246_v4 }
 0xa96   : > { %2035 = vmatpush3.bf16.msra.mxu0 %v2135_v57 }
 0xb64   : > { %v1457_v45 = vpop.f32.mrb[32].mxu0 }
 0xb65   : > { %v1463_v46 = vadd.f32 %v1457_v45, %v1279_v33  ;;  %v2022_v47 = vpop.f32.mrb[33].mxu0 }
 0xb66   : > { %v1460_v48 = vpop.f32.mrb[34].mxu0 }
 0xb67   : > { %v1464_v49 = vadd.f32 %v1463_v46, %v2387_v0  ;;  %v2023_v50 = vpop.f32.mrb[35].mxu0  ;;  %v2134_v0 = vld [vmem:[%s2741_s7 + $0x8] sm:$0xff]  }
 0xb68   : > { %2027 = vmatpush3.bf16.msra.mxu1 %v2134_v0 }
 0xb69   : > { %v1466_v51 = vmul.f32 %v1464_v49, %v1464_v49  ;;  %1465 = vst.msk [vmem:[%s2627_s19] sm:$0xff] %vm484_vm0, %v1464_v49  ;;  %2040 = vmatprep.subr.bf16.mxu1 %v2246_v4 }
 0xb6b   : > { %v1467_v53 = vsel %vm484_vm0, %v1466_v51, 0.0 }
 0xb6c   : > { %1468 = vadd.xlane.f32.xlu1 %v1467_v53 }
 0xb70   : > { %v1611_v25 = vld [vmem:[%s2627_s19] sm:$0xff] }
 0xbf9   : > { %v1469_v52 = vpop.xlane.xlu1 %1468 }
 0xbfa   : > { %v1470_v58 = vmul.f32 0.03125, %v1469_v52 }
 0xbfc   : > { %v1471_v59 = vadd.f32 1e-05, %v1470_v58 }
 0xbfe   : > { %2160 = vrsqrt.f32 %v1471_v59 }
 0xc08   : > { %v2161_v60 = vpop.eup %2160 }
 0xc09   : > { %v1473_v62 = vmul.f32 %v2161_v60, %v1464_v49 }
 0xc0b   : > { %v1481_v63 = vmul.f32 %v1864_v61, %v1473_v62 }
 0xc0d   : > { %v1482_v38 = vpack.c.bf16 %v1481_v63, %v1481_v63 }
 0xc0f   : > { %1484 = vst.msk [vmem:[#allocation2] sm:$0xf] %vm1483_vm5, %v1482_v38 }
 0xc16   : > { %v1485_v1 = vld [vmem:[#allocation2] sm:$0xf] }
 0xc17   : > { %2029 = vmatmul.mubr.msk.bf16.vlgmr.msra.gmra.mrb[24].mxu1 %vm484_vm0, %v1485_v1  ;;  %2037 = vmatmul.mubr.msk.bf16.vlgmr.msra.gmra.mrb[36].mxu0 %vm484_vm0, %v1485_v1 }
 0xc18   : > { %2052 = vmatprep.mubr.msk.bf16.mxu1 %vm2247_vm1, %v2246_v4  ;;  %2041 = vmatpush3.bf16.msra.mxu1 %v2136_v21 }
 0xc19   : > { %2042 = vmatprep.subr.bf16.mxu1 %v2246_v4 }
 0xc1c   : > { %2043 = vmatpush3.bf16.msra.mxu1 %v2137_v41 }
 0xc1d   : > { %2044 = vmatprep.subr.bf16.mxu1 %v2246_v4 }
 0xc20   : > { %2045 = vmatpush3.bf16.msra.mxu1 %v2138_v56 }
 0xc21   : > { %2046 = vmatprep.subr.bf16.mxu1 %v2246_v4 }
 0xc24   : > { %2047 = vmatpush3.bf16.msra.mxu1 %v2139_v2 }
 0xc25   : > { %2048 = vmatprep.subr.bf16.mxu1 %v2246_v4 }
 0xc28   : > { %2049 = vmatpush3.bf16.msra.mxu1 %v2140_v3 }
 0xc29   : > { %2050 = vmatprep.subr.bf16.mxu1 %v2246_v4 }
 0xc2c   : > { %2051 = vmatpush3.bf16.msra.mxu1 %v2141_v5 }
 0xcea   : > { %v1540_v8 = vpop.f32.mrb[24].mxu1  ;;  %v1596_v9 = vpop.f32.mrb[36].mxu0 }
 0xceb   : > { %v1602_v10 = vsub.f32 0.0, %v1540_v8  ;;  %v2030_v11 = vpop.f32.mrb[25].mxu1  ;;  %v2038_v12 = vpop.f32.mrb[37].mxu0 }
 0xcec   : > { %v1543_v13 = vpop.f32.mrb[26].mxu1  ;;  %v1599_v14 = vpop.f32.mrb[38].mxu0 }
 0xced   : > { %v1603_v15 = vmul.f32 1.442695, %v1602_v10  ;;  %v2031_v16 = vpop.f32.mrb[27].mxu1  ;;  %v2039_v17 = vpop.f32.mrb[39].mxu0 }
 0xcef   : > { %2162 = vpow2.f32 %v1603_v15 }
 0xcf9   : > { %v2163_v4 = vpop.eup %2162 }
 0xcfa   : > { %v1605_v18 = vadd.f32 1.0, %v2163_v4 }
 0xcfc   : > { %2164 = vrcp.f32 %v1605_v18 }
 0xd06   : > { %v2165_v19 = vpop.eup %2164 }
 0xd07   : > { %v1608_v23 = vmul.f32 %v2165_v19, %v1540_v8 }
 0xd09   : > { %v1609_v24 = vmul.f32 %v1608_v23, %v1596_v9 }
 0xd0b   : > { %v1610_v7 = vpack.c.bf16 %v1609_v24, %v1609_v24 }
 0xd0d   : > { %2053 = vmatmul.mubr.msk.bf16.vlgmr.msra.gmra.mrb[28].mxu1 %vm1660_vm6, %v1610_v7 }
 0xde0   : > { %v1698_v6 = vpop.f32.mrb[28].mxu1 }
 0xde1   : > { %v1704_v26 = vadd.f32 %v1698_v6, %v1611_v25  ;;  %v2054_v27 = vpop.f32.mrb[29].mxu1 }
 0xde2   : > { %v1701_v28 = vpop.f32.mrb[30].mxu1 }
 0xde3   : > { %1705 = vst.msk [vmem:[%s2627_s19] sm:$0xff] %vm484_vm0, %v1704_v26  ;;  %v2055_v30 = vpop.f32.mrb[31].mxu1 }
 0xde4   : > { %2179 = shalt.err (!%p2176_p5)
}
 0xde5   : > { %s2180_s19 = scalar_lea.hbm %s2683_s0, 128  ;;  %s2184_s30 = scalar_lea.hbm %s2746_s12, 256 }
 0xde6   : > { %p2181_p6 = scmp.ne.s32.totalorder %s2683_s0, %s2180_s19  ;;  %p2185_p10 = scmp.lt.u32.totalorder %s2683_s0, %s2746_s12 }
 0xde7   : > { %p2186_p11 = scmp.lt.u32.totalorder %s2184_s30, %s2180_s19  ;;  %p2188_p13 = scmp.lt.u32.totalorder %s2180_s19, %s2683_s0 }
 0xde8   : > { %p2182_p7 = pnand %p2181_p6, %p2367_p4 }
 0xde9   : > { %p2187_p12 = por %p2186_p11, %p2185_p10 }
 0xdea   : > { %p2183_p9 = pneg %p2182_p7 }
 0xdeb   : > { %p2189_p0 = por %p2188_p13, %p2187_p12 }
 0xded   : > { %p2190_p1 = pnand %p2189_p0, %p2183_p9 }
 0xdef   : > { %2193 = shalt.err (!%p2190_p1)
}
 0xdf0   : > { %2056 = dma.vmem_to_hbm [thread:$0]  (%p2367_p4), %s2685_s17, 128, %s2683_s0, %s1707_s27  }
 0xdf1 PF: > { %p2062_p2 = scmp.ge.s32.totalorder %s2244_s26, 2  ;;  %s1732_s20 = sand.u32 1, %s2224_s21  }
 0xdf2   : > { %s1733_s1 = scalar_lea.sflag [#allocation4], %s1732_s20 }
 0xdf3   : > { %p2059_p3 = pnand %p2062_p2, %p2374_p8 }
 0xdf5   : > { %2219 = dma.done.wait (!%p2059_p3), %s1733_s1, 128  }
 0xdf6   : > { %2221 = vsyncadd (!%p2059_p3), %s1733_s1, 4294967168  ;;  %s25_s26 = sadd.s32 1, %s2244_s26   ;;  %s2755_s21 = smov %s2228_s22 }
 0xdf7   : > { %p22_p5 = scmp.ge.s32.totalorder %s25_s26, 4   ;;  %s2756_s22 = smov %s2232_s23 }
 0xdf8   : > { %s2757_s23 = smov %s2380_s16  ;;  %s2758_s24 = smov %s2240_s25 }
 0xdf9   : > { %s2759_s25 = smov %s2761_s29  ;;  %24 = sbr.rel (!%p22_p5) target bundleno = 7 (0x7), region = 116 }
 0xe00   :  { %1738 = vsyncpa [#allocation4], 1 }
 0xe01   :  { %1740 = vsyncpa [#allocation4 + $0x1], 1 }

</bundles_post_ra>
